<compile_context>
chip_gen: v5e
topology: v5e:2x2
jax: 0.10.0
libtpu: 0.0.40
codegen_flags: <defaults>
</compile_context>

<pallas_src>
import functools

import jax
import jax.numpy as jnp
import numpy as np
from jax.experimental import pallas as pl
from jax.experimental.pallas import tpu as pltpu


def _poscnn_kernel(x_ref, m_ref, w_ref, b_ref, o_ref, *, W, N, Np):
    # x_ref : (TB, TC, N)  flattened NCHW activation block (N = H*W)
    # m_ref : (2, Np)      f32 {0,1} masks: row 0 = "left neighbour valid",
    #                      row 1 = "right neighbour valid" (0 on the zero tail)
    # w_ref : (TC, 9)      depthwise 3x3 taps, k = di*3 + dj (PyTorch order)
    # b_ref : (TC, 1)      bias
    # o_ref : (TB, TC, N)  output block
    TB, TC = x_ref.shape[0], x_ref.shape[1]
    f32 = jnp.float32

    # End-pad with >= W zero lanes: the +-W (vertical) rolls below wrap through
    # this zero tail, so the top/bottom image border needs no masking at all.
    x = x_ref[...].astype(f32)                                       # (TB, TC, N)
    xp = jnp.concatenate(
        [x, jnp.zeros((TB, TC, Np - N), dtype=f32)], axis=2)         # (TB, TC, Np)

    m_l = m_ref[0:1, :].astype(f32).reshape(1, 1, Np)
    m_r = m_ref[1:2, :].astype(f32).reshape(1, 1, Np)

    # Horizontal neighbours built once (XLU roll + one multiply each), reused
    # by three taps each.
    v_l = pltpu.roll(xp, shift=1, axis=2) * m_l        # x[h, w-1]  (0 at w == 0)
    v_r = pltpu.roll(xp, shift=Np - 1, axis=2) * m_r   # x[h, w+1]  (0 at w == W-1)
    variants = (v_l, xp, v_r)                          # dj = 0, 1, 2

    w = w_ref[...].astype(f32)                         # (TC, 9), hoisted
    acc = jnp.broadcast_to(b_ref[...].astype(f32).reshape(1, TC, 1),
                           (TB, TC, Np))               # bias folded into the init

    # 3x3 taps: vertical shifts are plain rolls (zero tail supplies the border).
    for di, vshift in ((0, W), (1, 0), (2, Np - W)):   # row offset = di - 1
        for dj in range(3):                            # col offset = dj - 1
            v = variants[dj]
            t = v if vshift == 0 else pltpu.roll(v, shift=vshift, axis=2)
            k = di * 3 + dj
            wk = w[:, k:k + 1].reshape(1, TC, 1)       # per-channel scalar tap
            acc = acc + t * wk

    o_ref[...] = acc[:, :, :N].astype(o_ref.dtype)


def _pick_tiles(B, C, Np):
    """Pick (batch tile TB, channel tile TC) for a (TB, TC, N) block."""
    budget = 1 << 20                      # ~1 MiB padded f32 working tile (v7x-safe)
    per_c = Np * 4                        # f32 bytes per channel of the padded tile
    if C * per_c <= budget:
        TC = C                            # full-C block: contiguous DMAs, fewest steps
        TB = 1
        for tb in range(B, 0, -1):        # fold batch images in while budget allows
            if B % tb == 0 and tb * C * per_c <= budget:
                TB = tb
                break
    else:
        TB = 1
        TC = C                            # fallback: full dim is always a legal block
        for tc in range(C - 1, 0, -1):    # largest divisor of C, multiple of 8
            if C % tc == 0 and tc % 8 == 0 and tc * per_c <= budget:
                TC = tc
                break
    return TB, TC


@jax.jit
def pos_cnn_forward(x_nchw, weight, bias):
    """PosCNN forward (stride s=1): depthwise 3x3 conv + bias, NCHW in / NCHW out."""
    B, C, H, W = x_nchw.shape
    assert weight.shape == (C, 1, 3, 3), "groups == embed_dim needs in_chans == embed_dim"
    assert bias.shape == (C,)

    N = H * W
    # Padded lane extent: >= N + W (so +-W rolls wrap into zeros), rounded up to
    # a multiple of 128 so every roll / store works on lane-aligned vregs.
    Np = ((N + W + 127) // 128) * 128

    # Free reshapes only -- no transpose or pad passes over HBM.
    x_flat = x_nchw.reshape(B, C, N)
    w_flat = weight.reshape(C, 9)                       # k = di*3 + dj
    b2d = bias.reshape(C, 1)

    # Host-precomputed left/right-neighbour validity masks over the padded lane
    # axis (also 0 on the zero tail) -> no iota/mod work inside the kernel.
    q = np.arange(Np)
    col = q % W
    m_l = ((q < N) & (col != 0)).astype(np.float32)
    m_r = ((q < N) & (col != W - 1)).astype(np.float32)
    masks = jnp.asarray(np.stack([m_l, m_r]))           # (2, Np)

    TB, TC = _pick_tiles(B, C, Np)
    grid = (C // TC, B // TB)   # channel tiles outer -> weight/bias blocks are
                                # constant along the inner axis (no re-DMA)

    kernel = functools.partial(_poscnn_kernel, W=W, N=N, Np=Np)
    out_flat = pl.pallas_call(
        kernel,
        out_shape=jax.ShapeDtypeStruct((B, C, N), x_nchw.dtype),
        grid_spec=pltpu.PrefetchScalarGridSpec(
            num_scalar_prefetch=0,
            grid=grid,
            in_specs=[
                pl.BlockSpec((TB, TC, N), lambda c, b: (b, c, 0)),
                pl.BlockSpec((2, Np), lambda c, b: (0, 0)),
                pl.BlockSpec((TC, 9), lambda c, b: (c, 0)),
                pl.BlockSpec((TC, 1), lambda c, b: (c, 0)),
            ],
            out_specs=pl.BlockSpec((TB, TC, N), lambda c, b: (b, c, 0)),
        ),
        compiler_params=pltpu.CompilerParams(
            dimension_semantics=("parallel", "parallel"),
            vmem_limit_bytes=32 * 1024 * 1024,
        ),
    )(x_flat, masks, w_flat, b2d)

    return out_flat.reshape(B, C, H, W)


def _reference_forward(x_nchw, weight, bias):
    # Pure-JAX reference: depthwise conv via lax.conv_general_dilated (f32 exact).
    C = x_nchw.shape[1]
    out = jax.lax.conv_general_dilated(
        x_nchw, weight,
        window_strides=(1, 1),
        padding=((1, 1), (1, 1)),
        dimension_numbers=("NCHW", "OIHW", "NCHW"),
        feature_group_count=C,
        precision=jax.lax.Precision.HIGHEST,
    )
    return out + bias.reshape(1, C, 1, 1)


if __name__ == "__main__":
    # Small shapes consistent with the module (in_chans == embed_dim, s == 1).
    for (B, C, H, W) in [(2, 32, 16, 16), (2, 64, 14, 14)]:
        key = jax.random.PRNGKey(0)
        kx, kw, kb = jax.random.split(key, 3)
        x = jax.random.normal(kx, (B, C, H, W), dtype=jnp.float32)
        weight = jax.random.normal(kw, (C, 1, 3, 3), dtype=jnp.float32) * 0.1
        bias = jax.random.normal(kb, (C,), dtype=jnp.float32) * 0.1

        out = jax.block_until_ready(pos_cnn_forward(x, weight, bias))
        ref = jax.block_until_ready(_reference_forward(x, weight, bias))
        np.testing.assert_allclose(np.asarray(out), np.asarray(ref),
                                   rtol=1e-5, atol=1e-5)

    print("KERNEL_OK")
</pallas_src>

<mosaic_0001>
module attributes {stable_mosaic.version = 11 : i64} {
  func.func @_poscnn_kernel(%arg0: i32, %arg1: i32, %arg2: memref<2x32x256xf32, #tpu.memory_space<vmem>>, %arg3: memref<2x384xf32, #tpu.memory_space<vmem>>, %arg4: memref<32x9xf32, #tpu.memory_space<vmem>>, %arg5: memref<32x1xf32, #tpu.memory_space<vmem>>, %arg6: memref<2x32x256xf32, #tpu.memory_space<vmem>>) attributes {dimension_semantics = [#tpu.dimension_semantics<parallel>, #tpu.dimension_semantics<parallel>], iteration_bounds = array<i64: 1, 1>, scalar_prefetch = 0 : i64, scratch_operands = 0 : i64, tpu.core_type = #tpu.core_type<tc>, window_params = [{transform_indices = @transform_0, window_bounds = array<i64: 2, 32, 256>}, {pipeline_mode = #tpu.pipeline_mode<synchronous>, transform_indices = @transform_1, window_bounds = array<i64: 2, 384>}, {transform_indices = @transform_2, window_bounds = array<i64: 32, 9>}, {transform_indices = @transform_3, window_bounds = array<i64: 32, 1>}, {transform_indices = @transform_4, window_bounds = array<i64: 2, 32, 256>}]} {
    %c0 = arith.constant 0 : index
    %c0_0 = arith.constant 0 : index
    %c0_1 = arith.constant 0 : index
    %0 = vector.load %arg2[%c0, %c0_0, %c0_1] : memref<2x32x256xf32, #tpu.memory_space<vmem>>, vector<2x32x256xf32>
    %cst = arith.constant 0.000000e+00 : f32
    %1 = vector.broadcast %cst : f32 to vector<2x32x128xf32>
    %2 = tpu.concatenate %0, %1 in 2 : vector<2x32x256xf32>, vector<2x32x128xf32> -> vector<2x32x384xf32>
    %c0_2 = arith.constant 0 : index
    %c0_3 = arith.constant 0 : index
    %3 = vector.load %arg3[%c0_2, %c0_3] : memref<2x384xf32, #tpu.memory_space<vmem>>, vector<1x384xf32>
    %4 = vector.shape_cast %3 : vector<1x384xf32> to vector<1x1x384xf32>
    %c1 = arith.constant 1 : index
    %c0_4 = arith.constant 0 : index
    %5 = vector.load %arg3[%c1, %c0_4] : memref<2x384xf32, #tpu.memory_space<vmem>>, vector<1x384xf32>
    %6 = vector.shape_cast %5 : vector<1x384xf32> to vector<1x1x384xf32>
    %c1_i32 = arith.constant 1 : i32
    %7 = tpu.dynamic_rotate %2 by %c1_i32 dim 2 : vector<2x32x384xf32>, i32 -> vector<2x32x384xf32>
    %8 = vector.broadcast %4 : vector<1x1x384xf32> to vector<2x32x384xf32>
    %9 = arith.mulf %7, %8 : vector<2x32x384xf32>
    %c383_i32 = arith.constant 383 : i32
    %10 = tpu.dynamic_rotate %2 by %c383_i32 dim 2 : vector<2x32x384xf32>, i32 -> vector<2x32x384xf32>
    %11 = vector.broadcast %6 : vector<1x1x384xf32> to vector<2x32x384xf32>
    %12 = arith.mulf %10, %11 : vector<2x32x384xf32>
    %c0_5 = arith.constant 0 : index
    %c0_6 = arith.constant 0 : index
    %13 = vector.load %arg4[%c0_5, %c0_6] : memref<32x9xf32, #tpu.memory_space<vmem>>, vector<32x9xf32>
    %c0_7 = arith.constant 0 : index
    %c0_8 = arith.constant 0 : index
    %14 = vector.load %arg5[%c0_7, %c0_8] : memref<32x1xf32, #tpu.memory_space<vmem>>, vector<32x1xf32>
    %15 = vector.shape_cast %14 : vector<32x1xf32> to vector<1x32x1xf32>
    %16 = vector.shape_cast %15 : vector<1x32x1xf32> to vector<1x32x1xf32>
    %17 = vector.broadcast %16 : vector<1x32x1xf32> to vector<2x32x384xf32>
    %c16_i32 = arith.constant 16 : i32
    %18 = tpu.dynamic_rotate %9 by %c16_i32 dim 2 : vector<2x32x384xf32>, i32 -> vector<2x32x384xf32>
    %19 = vector.extract_strided_slice %13 {offsets = [0, 0], sizes = [32, 1], strides = [1, 1]} : vector<32x9xf32> to vector<32x1xf32>
    %20 = vector.shape_cast %19 : vector<32x1xf32> to vector<1x32x1xf32>
    %21 = vector.broadcast %20 : vector<1x32x1xf32> to vector<2x32x384xf32>
    %22 = arith.mulf %18, %21 : vector<2x32x384xf32>
    %23 = arith.addf %17, %22 : vector<2x32x384xf32>
    %c16_i32_9 = arith.constant 16 : i32
    %24 = tpu.dynamic_rotate %2 by %c16_i32_9 dim 2 : vector<2x32x384xf32>, i32 -> vector<2x32x384xf32>
    %25 = vector.extract_strided_slice %13 {offsets = [0, 1], sizes = [32, 1], strides = [1, 1]} : vector<32x9xf32> to vector<32x1xf32>
    %26 = vector.shape_cast %25 : vector<32x1xf32> to vector<1x32x1xf32>
    %27 = vector.broadcast %26 : vector<1x32x1xf32> to vector<2x32x384xf32>
    %28 = arith.mulf %24, %27 : vector<2x32x384xf32>
    %29 = arith.addf %23, %28 : vector<2x32x384xf32>
    %c16_i32_10 = arith.constant 16 : i32
    %30 = tpu.dynamic_rotate %12 by %c16_i32_10 dim 2 : vector<2x32x384xf32>, i32 -> vector<2x32x384xf32>
    %31 = vector.extract_strided_slice %13 {offsets = [0, 2], sizes = [32, 1], strides = [1, 1]} : vector<32x9xf32> to vector<32x1xf32>
    %32 = vector.shape_cast %31 : vector<32x1xf32> to vector<1x32x1xf32>
    %33 = vector.broadcast %32 : vector<1x32x1xf32> to vector<2x32x384xf32>
    %34 = arith.mulf %30, %33 : vector<2x32x384xf32>
    %35 = arith.addf %29, %34 : vector<2x32x384xf32>
    %36 = vector.extract_strided_slice %13 {offsets = [0, 3], sizes = [32, 1], strides = [1, 1]} : vector<32x9xf32> to vector<32x1xf32>
    %37 = vector.shape_cast %36 : vector<32x1xf32> to vector<1x32x1xf32>
    %38 = vector.broadcast %37 : vector<1x32x1xf32> to vector<2x32x384xf32>
    %39 = arith.mulf %9, %38 : vector<2x32x384xf32>
    %40 = arith.addf %35, %39 : vector<2x32x384xf32>
    %41 = vector.extract_strided_slice %13 {offsets = [0, 4], sizes = [32, 1], strides = [1, 1]} : vector<32x9xf32> to vector<32x1xf32>
    %42 = vector.shape_cast %41 : vector<32x1xf32> to vector<1x32x1xf32>
    %43 = vector.broadcast %42 : vector<1x32x1xf32> to vector<2x32x384xf32>
    %44 = arith.mulf %2, %43 : vector<2x32x384xf32>
    %45 = arith.addf %40, %44 : vector<2x32x384xf32>
    %46 = vector.extract_strided_slice %13 {offsets = [0, 5], sizes = [32, 1], strides = [1, 1]} : vector<32x9xf32> to vector<32x1xf32>
    %47 = vector.shape_cast %46 : vector<32x1xf32> to vector<1x32x1xf32>
    %48 = vector.broadcast %47 : vector<1x32x1xf32> to vector<2x32x384xf32>
    %49 = arith.mulf %12, %48 : vector<2x32x384xf32>
    %50 = arith.addf %45, %49 : vector<2x32x384xf32>
    %c368_i32 = arith.constant 368 : i32
    %51 = tpu.dynamic_rotate %9 by %c368_i32 dim 2 : vector<2x32x384xf32>, i32 -> vector<2x32x384xf32>
    %52 = vector.extract_strided_slice %13 {offsets = [0, 6], sizes = [32, 1], strides = [1, 1]} : vector<32x9xf32> to vector<32x1xf32>
    %53 = vector.shape_cast %52 : vector<32x1xf32> to vector<1x32x1xf32>
    %54 = vector.broadcast %53 : vector<1x32x1xf32> to vector<2x32x384xf32>
    %55 = arith.mulf %51, %54 : vector<2x32x384xf32>
    %56 = arith.addf %50, %55 : vector<2x32x384xf32>
    %c368_i32_11 = arith.constant 368 : i32
    %57 = tpu.dynamic_rotate %2 by %c368_i32_11 dim 2 : vector<2x32x384xf32>, i32 -> vector<2x32x384xf32>
    %58 = vector.extract_strided_slice %13 {offsets = [0, 7], sizes = [32, 1], strides = [1, 1]} : vector<32x9xf32> to vector<32x1xf32>
    %59 = vector.shape_cast %58 : vector<32x1xf32> to vector<1x32x1xf32>
    %60 = vector.broadcast %59 : vector<1x32x1xf32> to vector<2x32x384xf32>
    %61 = arith.mulf %57, %60 : vector<2x32x384xf32>
    %62 = arith.addf %56, %61 : vector<2x32x384xf32>
    %c368_i32_12 = arith.constant 368 : i32
    %63 = tpu.dynamic_rotate %12 by %c368_i32_12 dim 2 : vector<2x32x384xf32>, i32 -> vector<2x32x384xf32>
    %64 = vector.extract_strided_slice %13 {offsets = [0, 8], sizes = [32, 1], strides = [1, 1]} : vector<32x9xf32> to vector<32x1xf32>
    %65 = vector.shape_cast %64 : vector<32x1xf32> to vector<1x32x1xf32>
    %66 = vector.broadcast %65 : vector<1x32x1xf32> to vector<2x32x384xf32>
    %67 = arith.mulf %63, %66 : vector<2x32x384xf32>
    %68 = arith.addf %62, %67 : vector<2x32x384xf32>
    %69 = vector.extract_strided_slice %68 {offsets = [0, 0, 0], sizes = [2, 32, 256], strides = [1, 1, 1]} : vector<2x32x384xf32> to vector<2x32x256xf32>
    %c0_13 = arith.constant 0 : index
    %c0_14 = arith.constant 0 : index
    %c0_15 = arith.constant 0 : index
    %70 = vector.load %arg6[%c0_13, %c0_14, %c0_15] : memref<2x32x256xf32, #tpu.memory_space<vmem>>, vector<2x32x256xf32>
    tpu.vector_store %arg6[%c0_13, %c0_14, %c0_15], %69 {strides = array<i32>} : memref<2x32x256xf32, #tpu.memory_space<vmem>>, vector<2x32x256xf32>,
    return
  }
  func.func @transform_0(%arg0: i32, %arg1: i32) -> (i32, i32, i32) {
    %c0_i32 = arith.constant 0 : i32
    %c0_i32_0 = arith.constant 0 : i32
    return %arg1, %arg0, %c0_i32 : i32, i32, i32
  }
  func.func @transform_1(%arg0: i32, %arg1: i32) -> (i32, i32) {
    %c0_i32 = arith.constant 0 : i32
    %c0_i32_0 = arith.constant 0 : i32
    %c0_i32_1 = arith.constant 0 : i32
    return %c0_i32, %c0_i32_0 : i32, i32
  }
  func.func @transform_2(%arg0: i32, %arg1: i32) -> (i32, i32) {
    %c0_i32 = arith.constant 0 : i32
    %c0_i32_0 = arith.constant 0 : i32
    return %arg0, %c0_i32 : i32, i32
  }
  func.func @transform_3(%arg0: i32, %arg1: i32) -> (i32, i32) {
    %c0_i32 = arith.constant 0 : i32
    %c0_i32_0 = arith.constant 0 : i32
    return %arg0, %c0_i32 : i32, i32
  }
  func.func @transform_4(%arg0: i32, %arg1: i32) -> (i32, i32, i32) {
    %c0_i32 = arith.constant 0 : i32
    %c0_i32_0 = arith.constant 0 : i32
    return %arg1, %arg0, %c0_i32 : i32, i32, i32
  }
}

</mosaic_0001>

<bundles_post_ra>
// kernel: pos_cnn_forward.1
= control target key start
LH: loop header
LB: loop body
LE: loop exit
PB: predicated region body
PF: predicated region fallthrough
CT: control target
= control target key end

     0   :  { %s1121_s21 = smov 1   ;;  %v2802_v16 = vmov 0.0   ;;  %s1123_s23 = smov 127   ;;  %v1124_v18 = vmov 0   ;;  %v70_v30 = vlaneseq  ;;  %s2795_s0 = inlined_call_operand.vmem [shape: f32[2,32,256], index: 0, kind: input, shape index: {}]   ;;  %s2796_s3 = inlined_call_operand.vmem [shape: f32[32,1], index: 3, kind: input, shape index: {}]   ;;  %s2797_s1 = inlined_call_operand.vmem [shape: f32[2,384], index: 1, kind: input, shape index: {}]   ;;  %s2798_s2 = inlined_call_operand.vmem [shape: f32[32,9], index: 2, kind: input, shape index: {}]   ;;  %s2799_s4 = inlined_call_operand.vmem [shape: f32[2,32,256], index: 4, kind: output, shape index: {}]  }
   0x1   :  { %v1163_v0 = vld [vmem:[%s2795_s0 + $0x20] sm:$0xff]  ;;  %v1184_v3 = vld [vmem:[%s2795_s0 + $0x30] sm:$0xff]  ;;  %v1215_v8 = vld [vmem:[%s2795_s0 + $0x8] sm:$0xff]  ;;  %1075 = vset.pattern.permute.xlu1 %v1124_v18  ;;  %1077 = vset.pattern.permute.xlu0 %v1124_v18 }
   0x2   :  { %v1168_v1 = vld [vmem:[%s2795_s0] sm:$0xff]  ;;  %40 = vrot.lane.b32.xlu1 %v1163_v0, %s1121_s21  ;;  %v1189_v4 = vld [vmem:[%s2795_s0 + $0x10] sm:$0xff]  ;;  %v1226_v9 = vld [vmem:[%s2795_s0 + $0x28] sm:$0xff]  ;;  %1076 = vset.pattern.permute.xlu2 %v1124_v18  ;;  %v1309_v32 = vand.u32 127, %v70_v30 }
   0x3   :  { %v1173_v2 = vld [vmem:[%s2795_s0 + $0x40] sm:$0xff]  ;;  %36 = vrot.lane.b32.xlu0 %v1168_v1, %s1121_s21  ;;  %2877 = vst [vmem:[#allocation2_spill] sm:$0xff] %v1189_v4  ;;  %v1194_v5 = vld [vmem:[%s2795_s0 + $0x50] sm:$0xff]  ;;  %v1231_v10 = vld [vmem:[%s2795_s0 + $0x18] sm:$0xff] }
   0x4   :  { %44 = vrot.lane.b32.xlu2 %v1173_v2, %s1121_s21  ;;  %v1205_v6 = vld [vmem:[%s2795_s0 + $0x70] sm:$0xff]  ;;  %v1210_v7 = vld [vmem:[%s2795_s0 + $0x60] sm:$0xff]  ;;  %v1236_v11 = vld [vmem:[%s2795_s0 + $0x38] sm:$0xff]  ;;  %vm72_vm0 = vcmp.lt.s32.totalorder %v1309_v32, 1  ;;  %vm162_vm1 = vcmp.lt.s32.totalorder %v1309_v32, 127  ;;  %vm294_vm2 = vcmp.lt.s32.totalorder %v1309_v32, 16 }
   0x5   :  { %v1247_v12 = vld [vmem:[%s2795_s0 + $0x58] sm:$0xff]  ;;  %v1252_v13 = vld [vmem:[%s2795_s0 + $0x48] sm:$0xff]  ;;  %v222_v17 = vld [vmem:[%s2796_s3] sm:$0xff]  ;;  %vm765_vm3 = vcmp.lt.s32.totalorder %v1309_v32, 112 }
   0x6   :  { %v1257_v14 = vld [vmem:[%s2795_s0 + $0x68] sm:$0xff]  ;;  %v1268_v15 = vld [vmem:[%s2795_s0 + $0x78] sm:$0xff]  ;;  %v224_v22 = vld [vmem:[%s2796_s3 + $0x10] sm:$0xff] }
   0x7   :  { %v225_v19 = vld [vmem:[%s2796_s3 + $0x18] sm:$0xff]  ;;  %v223_v21 = vld [vmem:[%s2796_s3 + $0x8] sm:$0xff]  ;;  %v33_v33 = vld [vmem:[%s2797_s1] ss:$2 sm:$0x7]  ;;  %s1125_s3 = smov 16  }
   0x8   :  { %v98_v35 = vperm.slane %v33_v33, 0  ;;  %v99_v55 = vperm.slane %v33_v33, 1 }
   0xa   :  { %42 = vrot.lane.b32.xlu1 %v1184_v3, %s1121_s21 }
   0xb   :  { %38 = vrot.lane.b32.xlu0 %v1189_v4, %s1121_s21 }
   0xc   :  { %46 = vrot.lane.b32.xlu2 %v1194_v5, %s1121_s21 }
  0x12   :  { %50 = vrot.lane.b32.xlu1 %v1205_v6, %s1121_s21 }
  0x13   :  { %48 = vrot.lane.b32.xlu0 %v1210_v7, %s1121_s21 }
  0x14   :  { %52 = vrot.lane.b32.xlu2 %v1215_v8, %s1121_s21 }
  0x1a   :  { %56 = vrot.lane.b32.xlu1 %v1226_v9, %s1121_s21 }
  0x1b   :  { %54 = vrot.lane.b32.xlu0 %v1231_v10, %s1121_s21 }
  0x1c   :  { %58 = vrot.lane.b32.xlu2 %v1236_v11, %s1121_s21 }
  0x22   :  { %62 = vrot.lane.b32.xlu1 %v1247_v12, %s1121_s21 }
  0x23   :  { %60 = vrot.lane.b32.xlu0 %v1252_v13, %s1121_s21 }
  0x24   :  { %64 = vrot.lane.b32.xlu2 %v1257_v14, %s1121_s21 }
  0x2a   :  { %68 = vrot.lane.b32.xlu1 %v2802_v16, %s1121_s21 }
  0x2b   :  { %66 = vrot.lane.b32.xlu0 %v1268_v15, %s1121_s21 }
  0x2c   :  { %128 = vrot.lane.b32.xlu2 %v1168_v1, %s1123_s23 }
  0x32   :  { %132 = vrot.lane.b32.xlu1 %v1163_v0, %s1123_s23 }
  0x33   :  { %130 = vrot.lane.b32.xlu0 %v1189_v4, %s1123_s23 }
  0x34   :  { %134 = vrot.lane.b32.xlu2 %v1184_v3, %s1123_s23 }
  0x3a   :  { %138 = vrot.lane.b32.xlu1 %v1194_v5, %s1123_s23 }
  0x3b   :  { %136 = vrot.lane.b32.xlu0 %v1173_v2, %s1123_s23 }
  0x3c   :  { %140 = vrot.lane.b32.xlu2 %v1210_v7, %s1123_s23 }
  0x42   :  { %144 = vrot.lane.b32.xlu1 %v1215_v8, %s1123_s23 }
  0x43   :  { %142 = vrot.lane.b32.xlu0 %v1205_v6, %s1123_s23 }
  0x44   :  { %146 = vrot.lane.b32.xlu2 %v1231_v10, %s1123_s23 }
  0x4a   :  { %150 = vrot.lane.b32.xlu1 %v1236_v11, %s1123_s23 }
  0x4b   :  { %148 = vrot.lane.b32.xlu0 %v1226_v9, %s1123_s23 }
  0x4c   :  { %152 = vrot.lane.b32.xlu2 %v1252_v13, %s1123_s23 }
  0x52   :  { %156 = vrot.lane.b32.xlu1 %v1257_v14, %s1123_s23 }
  0x53   :  { %154 = vrot.lane.b32.xlu0 %v1247_v12, %s1123_s23 }
  0x54   :  { %158 = vrot.lane.b32.xlu2 %v1268_v15, %s1123_s23 }
  0x5a   :  { %228 = vperm.xlu1 %1075, %v222_v17  }
  0x5b   :  { %160 = vrot.lane.b32.xlu0 %v2802_v16, %s1123_s23 }
  0x5c   :  { %233 = vperm.xlu2 %1076, %v223_v21  }
  0x5e   :  { %v45_v26 = vpop.permute.xlu2 %44 }
  0x62   :  { %243 = vperm.xlu1 %1075, %v225_v19  }
  0x63   :  { %238 = vperm.xlu0 %1077, %v224_v22  }
  0x66   :  { %v47_v29 = vpop.permute.xlu2 %46 }
  0x6e   :  { %v53_v36 = vpop.permute.xlu2 %52 }
  0x74   :  { %v41_v20 = vpop.permute.xlu1 %40 }
  0x75   :  { %v37_v25 = vpop.permute.xlu0 %36 }
  0x76   :  { %v59_v48 = vpop.permute.xlu2 %58  ;;  %v81_v62 = vsel %vm72_vm0, %v37_v25, %v53_v36 }
  0x77   :  { %v1391_v19 = vmul.f32 %v99_v55, %v81_v62 }
  0x79   :  { %2885 = vst [vmem:[#allocation10_spill] sm:$0xff] %v1391_v19 }
  0x7c   :  { %v1303_v23 = vpop.permute.xlu1 %42 }
  0x7d   :  { %v39_v28 = vpop.permute.xlu0 %38 }
  0x7e   :  { %v65_v56 = vpop.permute.xlu2 %64 }
  0x84   :  { %v51_v24 = vpop.permute.xlu1 %50 }
  0x85   :  { %v49_v34 = vpop.permute.xlu0 %48 }
  0x86   :  { %v1387_v17 = vpop.permute.xlu2 %128 }
  0x8c   :  { %v1305_v27 = vpop.permute.xlu1 %56 }
  0x8d   :  { %v55_v45 = vpop.permute.xlu0 %54  ;;  %v83_v63 = vsel %vm72_vm0, %v41_v20, %v1305_v27 }
  0x8e   :  { %v82_v52 = vsel %vm72_vm0, %v39_v28, %v55_v45  ;;  %v1393_v21 = vmul.f32 %v99_v55, %v83_v63 }
  0x8f   :  { %v1368_v58 = vmul.f32 %v99_v55, %v82_v52 }
  0x90   :  { %2886 = vst [vmem:[#allocation11_spill] sm:$0xff] %v1393_v21 }
  0x94   :  { %v1307_v31 = vpop.permute.xlu1 %62 }
  0x95   :  { %v61_v57 = vpop.permute.xlu0 %60 }
  0x96   :  { %v85_v61 = vsel %vm72_vm0, %v45_v26, %v61_v57 }
  0x97   :  { %v1389_v18 = vmul.f32 %v99_v55, %v85_v61  ;;  %v1483_v61 = vld [vmem:[%s2798_s2] sm:$0xff] }
  0x9c   :  { %v1315_v37 = vpop.permute.xlu1 %68 }
  0x9d   :  { %v92_v38 = vsel %vm72_vm0, %v1315_v37, %v1303_v23  ;;  %v89_v40 = vsel %vm72_vm0, %v1315_v37, %v37_v25  ;;  %v90_v41 = vsel %vm72_vm0, %v1315_v37, %v39_v28  ;;  %v95_v44 = vsel %vm72_vm0, %v1315_v37, %v49_v34  ;;  %v67_v22 = vpop.permute.xlu0 %66 }
  0x9e   :  { %v1321_v39 = vmul.f32 %v98_v35, %v92_v38  ;;  %v1329_v42 = vmul.f32 %v98_v35, %v89_v40  ;;  %v1331_v43 = vmul.f32 %v98_v35, %v90_v41  ;;  %v91_v46 = vsel %vm72_vm0, %v1315_v37, %v41_v20  ;;  %v1415_v38 = vpop.permute.xlu2 %134 }
  0x9f   :  { %v93_v47 = vsel %vm72_vm0, %v1315_v37, %v45_v26  ;;  %v1348_v49 = vmul.f32 %v98_v35, %v95_v44  ;;  %v1350_v50 = vmul.f32 %v98_v35, %v91_v46  ;;  %v94_v53 = vsel %vm72_vm0, %v1315_v37, %v47_v29 }
  0xa0   :  { %2878 = vst [vmem:[#allocation3_spill] sm:$0xff] %v1321_v39  ;;  %252 = vrot.lane.b32.xlu0 %v1321_v39, %s1125_s3  ;;  %246 = vrot.lane.b32.xlu2 %v1329_v42, %s1125_s3  ;;  %v1352_v51 = vmul.f32 %v98_v35, %v93_v47  ;;  %v96_v54 = vsel %vm72_vm0, %v1315_v37, %v51_v24 }
  0xa1   :  { %2879 = vst [vmem:[#allocation4_spill] sm:$0xff] %v1329_v42  ;;  %248 = vrot.lane.b32.xlu1 %v1331_v43, %s1125_s3  ;;  %v1370_v59 = vmul.f32 %v98_v35, %v94_v53  ;;  %v1372_v60 = vmul.f32 %v98_v35, %v96_v54  ;;  %v88_v20 = vsel %vm72_vm0, %v51_v24, %v67_v22  ;;  %v100_v24 = vperm.slane %v33_v33, 2 }
  0xa2   :  { %2880 = vst [vmem:[#allocation5_spill] sm:$0xff] %v1331_v43  ;;  %v84_v25 = vsel %vm72_vm0, %v1303_v23, %v59_v48  ;;  %v86_v26 = vsel %vm72_vm0, %v47_v29, %v1307_v31  ;;  %v1409_v28 = vmul.f32 %v99_v55, %v88_v20  ;;  %v87_v23 = vsel %vm72_vm0, %v49_v34, %v65_v56 }
  0xa3   :  { %2881 = vst [vmem:[#allocation6_spill] sm:$0xff] %v1350_v50  ;;  %v1411_v30 = vmul.f32 %v99_v55, %v84_v25  ;;  %v1413_v35 = vmul.f32 %v99_v55, %v86_v26  ;;  %v75_v29 = vsel %vm72_vm0, %v1305_v27, %v1315_v37  ;;  %v73_v40 = vsel %vm72_vm0, %v53_v36, %v1315_v37  ;;  %v1504_v25 = vld [vmem:[%s2798_s2 + $0x18] sm:$0xff] }
  0xa4   :  { %2882 = vst [vmem:[#allocation7_spill] sm:$0xff] %v1352_v51  ;;  %v1432_v41 = vmul.f32 %v99_v55, %v87_v23  ;;  %v1434_v44 = vmul.f32 %v100_v24, %v75_v29  ;;  %v1436_v46 = vmul.f32 %v100_v24, %v73_v40  ;;  %v78_v33 = vsel %vm72_vm0, %v1307_v31, %v1315_v37  ;;  %v1466_v31 = vpop.permute.xlu1 %132  ;;  %v1511_v23 = vld [vmem:[%s2798_s2 + $0x8] sm:$0xff]  ;;  %v1526_v40 = vld [vmem:[%s2798_s2 + $0x10] sm:$0xff] }
  0xa5   :  { %2883 = vst [vmem:[#allocation8_spill] sm:$0xff] %v1370_v59  ;;  %v76_v34 = vsel %vm72_vm0, %v59_v48, %v1315_v37  ;;  %v74_v36 = vsel %vm72_vm0, %v55_v45, %v1315_v37  ;;  %v1456_v47 = vpop.permute.xlu0 %130  ;;  %v1458_v52 = vmul.f32 %v100_v24, %v78_v33  ;;  %v79_v48 = vsel %vm72_vm0, %v65_v56, %v1315_v37 }
  0xa6   :  { %2884 = vst [vmem:[#allocation9_spill] sm:$0xff] %v1372_v60  ;;  %v1444_v27 = vpop.permute.xlu2 %140  ;;  %v1460_v53 = vmul.f32 %v100_v24, %v76_v34  ;;  %v1462_v54 = vmul.f32 %v100_v24, %v74_v36  ;;  %v77_v55 = vsel %vm72_vm0, %v61_v57, %v1315_v37  ;;  %v1485_v62 = vmul.f32 %v100_v24, %v79_v48 }
  0xa7   :  { %2887 = vst [vmem:[#allocation12_spill] sm:$0xff] %v1409_v28  ;;  %v1487_v63 = vmul.f32 %v100_v24, %v77_v55  ;;  %v80_v57 = vsel %vm72_vm0, %v67_v22, %v1315_v37  ;;  %v1126_v34 = vmov 1  }
  0xa8   :  { %258 = vrot.lane.b32.xlu0 %v1348_v49, %s1125_s3  ;;  %250 = vrot.lane.b32.xlu2 %v1350_v50, %s1125_s3  ;;  %2888 = vst [vmem:[#allocation13_spill] sm:$0xff] %v1411_v30  ;;  %v1513_v29 = vmul.f32 %v100_v24, %v80_v57 }
  0xa9   :  { %254 = vrot.lane.b32.xlu1 %v1352_v51, %s1125_s3  ;;  %2889 = vst [vmem:[#allocation14_spill] sm:$0xff] %v1413_v35 }
  0xaa   :  { %2890 = vst [vmem:[#allocation15_spill] sm:$0xff] %v1432_v41 }
  0xab   :  { %2891 = vst [vmem:[#allocation16_spill] sm:$0xff] %v1434_v44 }
  0xac   :  { %2892 = vst [vmem:[#allocation17_spill] sm:$0xff] %v1436_v46  ;;  %v1496_v56 = vpop.permute.xlu1 %138 }
  0xad   :  { %2893 = vst [vmem:[#allocation18_spill] sm:$0xff] %v1458_v52  ;;  %v1489_v20 = vpop.permute.xlu0 %136 }
  0xae   :  { %2894 = vst [vmem:[#allocation19_spill] sm:$0xff] %v1460_v53  ;;  %v1472_v45 = vpop.permute.xlu2 %146 }
  0xaf   :  { %2895 = vst [vmem:[#allocation20_spill] sm:$0xff] %v1462_v54 }
  0xb0   :  { %264 = vrot.lane.b32.xlu0 %v1368_v58, %s1125_s3  ;;  %256 = vrot.lane.b32.xlu2 %v1370_v59, %s1125_s3  ;;  %2896 = vst [vmem:[#allocation21_spill] sm:$0xff] %v1485_v62 }
  0xb1   :  { %260 = vrot.lane.b32.xlu1 %v1372_v60, %s1125_s3  ;;  %2897 = vst [vmem:[#allocation22_spill] sm:$0xff] %v1487_v63 }
  0xb2   :  { %2898 = vst [vmem:[#allocation23_spill] sm:$0xff] %v1504_v25 }
  0xb3   :  { %2899 = vst [vmem:[#allocation24_spill] sm:$0xff] %v1513_v29 }
  0xb4   :  { %v1521_v22 = vpop.permute.xlu1 %144 }
  0xb5   :  { %v1519_v37 = vpop.permute.xlu0 %142 }
  0xb6   :  { %v1506_v26 = vpop.permute.xlu2 %152 }
  0xb8   :  { %270 = vrot.lane.b32.xlu0 %v1389_v18, %s1125_s3  ;;  %262 = vrot.lane.b32.xlu2 %v1391_v19, %s1125_s3 }
  0xb9   :  { %266 = vrot.lane.b32.xlu1 %v1393_v21, %s1125_s3 }
  0xbc   :  { %v1537_v36 = vpop.permute.xlu1 %150 }
  0xbd   :  { %v1535_v24 = vpop.permute.xlu0 %148 }
  0xbe   :  { %v1528_v33 = vpop.permute.xlu2 %158 }
  0xc0   :  { %276 = vrot.lane.b32.xlu0 %v1409_v28, %s1125_s3  ;;  %268 = vrot.lane.b32.xlu2 %v1411_v30, %s1125_s3 }
  0xc1   :  { %272 = vrot.lane.b32.xlu1 %v1413_v35, %s1125_s3 }
  0xc4   :  { %v1551_v48 = vpop.permute.xlu1 %156 }
  0xc8   :  { %282 = vrot.lane.b32.xlu0 %v1434_v44, %s1125_s3  ;;  %274 = vrot.lane.b32.xlu2 %v1432_v41, %s1125_s3 }
  0xc9   :  { %278 = vrot.lane.b32.xlu1 %v1436_v46, %s1125_s3 }
  0xcc   :  { %v1563_v55 = vpop.permute.xlu1 %228 }
  0xd0   :  { %288 = vrot.lane.b32.xlu0 %v1458_v52, %s1125_s3  ;;  %280 = vrot.lane.b32.xlu2 %v1462_v54, %s1125_s3 }
  0xd1   :  { %284 = vrot.lane.b32.xlu1 %v1460_v53, %s1125_s3 }
  0xd8   :  { %313 = vperm.xlu0 %1077, %v1483_v61   ;;  %286 = vrot.lane.b32.xlu2 %v1487_v63, %s1125_s3 }
  0xd9   :  { %290 = vrot.lane.b32.xlu1 %v1485_v62, %s1125_s3 }
  0xe0   :  { %328 = vperm.xlu0 %1077, %v1504_v25   ;;  %292 = vrot.lane.b32.xlu2 %v1513_v29, %s1125_s3 }
  0xe1   :  { %318 = vperm.xlu1 %1075, %v1511_v23  }
  0xe8   :  { %367 = vrot.lane.b32.xlu0 %v1163_v0, %s1125_s3  ;;  %323 = vperm.xlu2 %1076, %v1526_v40   ;;  %v1545_v0 = vpop.permute.xlu2 %233 }
  0xe9   :  { %363 = vrot.lane.b32.xlu1 %v1168_v1, %s1125_s3  ;;  %1078 = vset.pattern.permute.xlu0 %v1126_v34  ;;  %v1547_v1 = vpop.permute.xlu0 %154 }
  0xea   :  { %1079 = vset.pattern.permute.xlu1 %v1126_v34 }
  0xf0   :  { %373 = vrot.lane.b32.xlu0 %v1194_v5, %s1125_s3  ;;  %365 = vrot.lane.b32.xlu2 %v1189_v4, %s1125_s3 }
  0xf1   :  { %369 = vrot.lane.b32.xlu1 %v1184_v3, %s1125_s3  ;;  %1080 = vset.pattern.permute.xlu2 %v1126_v34  ;;  %v1559_v5 = vpop.permute.xlu0 %160  ;;  %v175_v34 = vsel %vm162_vm1, %v1489_v20, %v1506_v26 }
  0xf8   :  { %379 = vrot.lane.b32.xlu0 %v1215_v8, %s1125_s3  ;;  %371 = vrot.lane.b32.xlu2 %v1173_v2, %s1125_s3 }
  0xf9   :  { %375 = vrot.lane.b32.xlu1 %v1210_v7, %s1125_s3  ;;  %v1573_v2 = vpop.permute.xlu0 %238  ;;  %v1579_v7 = vpop.permute.xlu1 %243 }
  0xfa   :  { %v1557_v3 = vpop.permute.xlu2 %246 }
 0x100   :  { %385 = vrot.lane.b32.xlu0 %v1236_v11, %s1125_s3  ;;  %377 = vrot.lane.b32.xlu2 %v1205_v6, %s1125_s3  ;;  %v1060_v6 = vld [vmem:[%s2797_s1 + $0x1] ss:$2 sm:$0x7]  ;;  %s1130_s1 = smov 112  }
 0x101   :  { %381 = vrot.lane.b32.xlu1 %v1231_v10, %s1125_s3 }
 0x102   :  { %v1569_v8 = vpop.permute.xlu2 %250 }
 0x108   :  { %391 = vrot.lane.b32.xlu0 %v1257_v14, %s1125_s3  ;;  %383 = vrot.lane.b32.xlu2 %v1226_v9, %s1125_s3  ;;  %v172_v9 = vsel %vm162_vm1, %v1456_v47, %v1472_v45 }
 0x109   :  { %387 = vrot.lane.b32.xlu1 %v1252_v13, %s1125_s3 }
 0x10a   :  { %v1581_v11 = vpop.permute.xlu2 %256 }
 0x110   :  { %414 = vperm.xlu0 %1078, %v1483_v61   ;;  %389 = vrot.lane.b32.xlu2 %v1247_v12, %s1125_s3 }
 0x111   :  { %393 = vrot.lane.b32.xlu1 %v1268_v15, %s1125_s3  ;;  %v188_v15 = vperm.slane %v1060_v6, 0 }
 0x112   :  { %v1592_v10 = vpop.permute.xlu0 %252  ;;  %v1598_v13 = vpop.permute.xlu2 %262 }
 0x113   :  { %v1600_v14 = vpop.permute.xlu1 %248  ;;  %v1602_v57 = vmul.f32 %v188_v15, %v172_v9  ;;  %v1619_v9 = vmul.f32 %v188_v15, %v175_v34  ;;  %v173_v34 = vsel %vm162_vm1, %v1466_v31, %v1535_v24 }
 0x114   :  { %v1645_v41 = vmul.f32 %v188_v15, %v173_v34  ;;  %v174_v34 = vsel %vm162_vm1, %v1415_v38, %v1537_v36 }
 0x115   :  { %2900 = vst [vmem:[#allocation25_spill] sm:$0xff] %v1602_v57 }
 0x116   :  { %2901 = vst [vmem:[#allocation26_spill] sm:$0xff] %v1619_v9 }
 0x117   :  { %2904 = vst [vmem:[#allocation29_spill] sm:$0xff] %v1645_v41 }
 0x118   :  { %463 = vrot.lane.b32.xlu0 %v1602_v57, %s1125_s3  ;;  %395 = vrot.lane.b32.xlu2 %v2802_v16, %s1125_s3  ;;  %v178_v57 = vsel %vm162_vm1, %v1519_v37, %v1528_v33 }
 0x119   :  { %418 = vperm.xlu1 %1079, %v1511_v23   ;;  %v1641_v54 = vmul.f32 %v188_v15, %v178_v57  ;;  %v165_v57 = vsel %vm162_vm1, %v1535_v24, %v1559_v5 }
 0x11a   :  { %v1609_v12 = vpop.permute.xlu0 %258  ;;  %v1615_v29 = vpop.permute.xlu2 %268 }
 0x11b   :  { %v1617_v62 = vpop.permute.xlu1 %254  ;;  %2902 = vst [vmem:[#allocation27_spill] sm:$0xff] %v1641_v54 }
 0x120   :  { %469 = vrot.lane.b32.xlu0 %v1619_v9, %s1125_s3  ;;  %422 = vperm.xlu2 %1080, %v1526_v40   ;;  %v171_v9 = vsel %vm162_vm1, %v1387_v17, %v1521_v22 }
 0x121   :  { %426 = vperm.xlu1 %1079, %v1504_v25   ;;  %v1643_v46 = vmul.f32 %v188_v15, %v171_v9  ;;  %v176_v9 = vsel %vm162_vm1, %v1496_v56, %v1547_v1 }
 0x122   :  { %v1625_v16 = vpop.permute.xlu0 %264  ;;  %v275_v53 = vpop.permute.xlu2 %274 }
 0x123   :  { %v1631_v63 = vpop.permute.xlu1 %260  ;;  %2903 = vst [vmem:[#allocation28_spill] sm:$0xff] %v1643_v46 }
 0x128   :  { %475 = vrot.lane.b32.xlu0 %v1641_v54, %s1125_s3  ;;  %461 = vrot.lane.b32.xlu2 %v1643_v46, %s1125_s3  ;;  %v1674_v54 = vmul.f32 %v188_v15, %v174_v34  ;;  %v163_v34 = vsel %vm162_vm1, %v1521_v22, %v1559_v5 }
 0x129   :  { %465 = vrot.lane.b32.xlu1 %v1645_v41, %s1125_s3  ;;  %v1669_v41 = vperm.slane %v1060_v6, 1 }
 0x12a   :  { %v271_v35 = vpop.permute.xlu0 %270  ;;  %v1655_v4 = vpop.permute.xlu2 %280  ;;  %2907 = vst [vmem:[#allocation32_spill] sm:$0xff] %v1674_v54 }
 0x12b   :  { %v1653_v30 = vpop.permute.xlu1 %266  ;;  %2905 = vst [vmem:[#allocation30_spill] sm:$0xff] %v1655_v4  ;;  %v1672_v46 = vmul.f32 %v1669_v41, %v165_v57  ;;  %v1676_v4 = vmul.f32 %v188_v15, %v176_v9  ;;  %v168_v57 = vsel %vm162_vm1, %v1547_v1, %v1559_v5  ;;  %v177_v9 = vsel %vm162_vm1, %v1444_v27, %v1551_v48 }
 0x12c   :  { %v1708_v1 = vmul.f32 %v1669_v41, %v163_v34 }
 0x12d   :  { %2906 = vst [vmem:[#allocation31_spill] sm:$0xff] %v1672_v46 }
 0x12e   :  { %2908 = vst [vmem:[#allocation33_spill] sm:$0xff] %v1676_v4 }
 0x12f   :  { %2912 = vst [vmem:[#allocation37_spill] sm:$0xff] %v1708_v1 }
 0x130   :  { %481 = vrot.lane.b32.xlu0 %v1672_v46, %s1125_s3  ;;  %467 = vrot.lane.b32.xlu2 %v1674_v54, %s1125_s3  ;;  %v1703_v46 = vmul.f32 %v1669_v41, %v168_v57  ;;  %v1705_v54 = vmul.f32 %v188_v15, %v177_v9  ;;  %v1716_v57 = vperm.slane %v1060_v6, 2  ;;  %v166_v9 = vsel %vm162_vm1, %v1537_v36, %v1559_v5 }
 0x131   :  { %471 = vrot.lane.b32.xlu1 %v1676_v4, %s1125_s3  ;;  %v1127_v4 = vmov 2   ;;  %v164_v6 = vsel %vm162_vm1, %v1472_v45, %v1559_v5  ;;  %v301_v45 = vsel %vm294_vm2, %v1609_v12, %v275_v53  ;;  %v169_v53 = vsel %vm162_vm1, %v1551_v48, %v1559_v5 }
 0x132   :  { %v1684_v24 = vpop.permute.xlu0 %276  ;;  %v1688_v19 = vpop.permute.xlu2 %286  ;;  %2910 = vst [vmem:[#allocation35_spill] sm:$0xff] %v1703_v46  ;;  %1082 = vset.pattern.permute.xlu0 %v1127_v4  ;;  %1083 = vset.pattern.permute.xlu1 %v1127_v4 }
 0x133   :  { %v1686_v21 = vpop.permute.xlu1 %272  ;;  %2911 = vst [vmem:[#allocation36_spill] sm:$0xff] %v1705_v54  ;;  %1081 = vset.pattern.permute.xlu2 %v1127_v4  ;;  %v179_v4 = vsel %vm162_vm1, %v1559_v5, %v1387_v17 }
 0x134   :  { %2909 = vst [vmem:[#allocation34_spill] sm:$0xff] %v1686_v21  ;;  %v1735_v34 = vmul.f32 %v1716_v57, %v179_v4 }
 0x136   :  { %2913 = vst [vmem:[#allocation38_spill] sm:$0xff] %v1735_v34 }
 0x138   :  { %487 = vrot.lane.b32.xlu0 %v1703_v46, %s1125_s3  ;;  %473 = vrot.lane.b32.xlu2 %v1705_v54, %s1125_s3  ;;  %v1741_v54 = vmul.f32 %v1669_v41, %v166_v9 }
 0x139   :  { %477 = vrot.lane.b32.xlu1 %v1708_v1, %s1125_s3  ;;  %v1738_v1 = vmul.f32 %v1669_v41, %v164_v6  ;;  %v182_v6 = vsel %vm162_vm1, %v1559_v5, %v1415_v38 }
 0x13a   :  { %v283_v22 = vpop.permute.xlu0 %282  ;;  %v1720_v15 = vpop.permute.xlu2 %292  ;;  %2915 = vst [vmem:[#allocation40_spill] sm:$0xff] %v1741_v54  ;;  %v1781_v46 = vmul.f32 %v1716_v57, %v182_v6  ;;  %v185_v6 = vsel %vm162_vm1, %v1559_v5, %v1444_v27 }
 0x13b   :  { %v1718_v21 = vpop.permute.xlu1 %278  ;;  %2914 = vst [vmem:[#allocation39_spill] sm:$0xff] %v1738_v1  ;;  %v305_v36 = vsel %vm294_vm2, %v283_v22, %v1569_v8 }
 0x13c   :  { %2916 = vst [vmem:[#allocation41_spill] sm:$0xff] %v1781_v46 }
 0x140   :  { %493 = vrot.lane.b32.xlu0 %v1735_v34, %s1125_s3  ;;  %479 = vrot.lane.b32.xlu2 %v1738_v1, %s1125_s3  ;;  %v167_v34 = vsel %vm162_vm1, %v1506_v26, %v1559_v5  ;;  %v1787_v1 = vmul.f32 %v1669_v41, %v169_v53  ;;  %v299_v26 = vsel %vm294_vm2, %v1617_v62, %v271_v35 }
 0x141   :  { %483 = vrot.lane.b32.xlu1 %v1741_v54, %s1125_s3  ;;  %v1784_v38 = vmul.f32 %v1669_v41, %v167_v34  ;;  %v170_v53 = vsel %vm162_vm1, %v1528_v33, %v1559_v5 }
 0x142   :  { %v1750_v17 = vpop.permute.xlu0 %288  ;;  %v1760_v9 = vpop.permute.xlu2 %323  ;;  %2918 = vst [vmem:[#allocation43_spill] sm:$0xff] %v1787_v1  ;;  %v1827_v27 = vmul.f32 %v1669_v41, %v170_v53  ;;  %v181_v53 = vsel %vm162_vm1, %v1559_v5, %v1466_v31 }
 0x143   :  { %v1758_v4 = vpop.permute.xlu1 %284  ;;  %v1775_v22 = vmul.f32 %v1760_v9, %v305_v36  ;;  %v1778_v54 = vmul.f32 %v1760_v9, %v301_v45  ;;  %2917 = vst [vmem:[#allocation42_spill] sm:$0xff] %v1784_v38 }
 0x144   :  { %2920 = vst [vmem:[#allocation45_spill] sm:$0xff] %v1827_v27 }
 0x148   :  { %499 = vrot.lane.b32.xlu0 %v1781_v46, %s1125_s3  ;;  %485 = vrot.lane.b32.xlu2 %v1784_v38, %s1125_s3 }
 0x149   :  { %489 = vrot.lane.b32.xlu1 %v1787_v1, %s1125_s3  ;;  %v1824_v1 = vmul.f32 %v1716_v57, %v185_v6 }
 0x14a   :  { %v1798_v48 = vpop.permute.xlu0 %313  ;;  %v1800_v45 = vpop.permute.xlu2 %365 }
 0x14b   :  { %v291_v34 = vpop.permute.xlu1 %290  ;;  %v1803_v36 = vmul.f32 %v1798_v48, %v299_v26  ;;  %v180_v26 = vsel %vm162_vm1, %v1559_v5, %v1456_v47  ;;  %2919 = vst [vmem:[#allocation44_spill] sm:$0xff] %v1824_v1  ;;  %v302_v47 = vsel %vm294_vm2, %v1631_v63, %v1684_v24  ;;  %v1860_v24 = vmul.f32 %v1716_v57, %v181_v53 }
 0x14c   :  { %v309_v35 = vsel %vm294_vm2, %v291_v34, %v1609_v12  ;;  %v1830_v33 = vmul.f32 %v1716_v57, %v180_v26  ;;  %v186_v53 = vsel %vm162_vm1, %v1559_v5, %v1519_v37 }
 0x14d   :  { %v1821_v46 = vmul.f32 %v1760_v9, %v309_v35  ;;  %v183_v35 = vsel %vm162_vm1, %v1559_v5, %v1489_v20  ;;  %2922 = vst [vmem:[#allocation47_spill] sm:$0xff] %v1860_v24  ;;  %v184_v20 = vsel %vm162_vm1, %v1559_v5, %v1496_v56  ;;  %v1129_v5 = vmov 4  }
 0x14e   :  { %2921 = vst [vmem:[#allocation46_spill] sm:$0xff] %v1830_v33  ;;  %v1863_v26 = vmul.f32 %v1716_v57, %v183_v35  ;;  %v1881_v35 = vmul.f32 %v1716_v57, %v184_v20 }
 0x150   :  { %505 = vrot.lane.b32.xlu0 %v1824_v1, %s1125_s3  ;;  %491 = vrot.lane.b32.xlu2 %v1827_v27, %s1125_s3  ;;  %2923 = vst [vmem:[#allocation48_spill] sm:$0xff] %v1863_v26 }
 0x151   :  { %495 = vrot.lane.b32.xlu1 %v1830_v33, %s1125_s3  ;;  %2924 = vst [vmem:[#allocation49_spill] sm:$0xff] %v1881_v35  ;;  %v1884_v33 = vmul.f32 %v1716_v57, %v186_v53 }
 0x152   :  { %v1842_v12 = vpop.permute.xlu0 %328  ;;  %v1846_v34 = vpop.permute.xlu2 %371 }
 0x153   :  { %v1844_v41 = vpop.permute.xlu1 %318  ;;  %v1849_v6 = vmul.f32 %v1842_v12, %v302_v47  ;;  %2925 = vst [vmem:[#allocation50_spill] sm:$0xff] %v1884_v33 }
 0x158   :  { %530 = vperm.xlu0 %1082, %v1511_v23   ;;  %497 = vrot.lane.b32.xlu2 %v1860_v24, %s1125_s3 }
 0x159   :  { %501 = vrot.lane.b32.xlu1 %v1863_v26, %s1125_s3  ;;  %v1128_v26 = vmov 3  }
 0x15a   :  { %v368_v31 = vpop.permute.xlu0 %367  ;;  %v1870_v1 = vpop.permute.xlu2 %377 }
 0x15b   :  { %v364_v47 = vpop.permute.xlu1 %363 }
 0x160   :  { %1086 = vset.pattern.permute.xlu0 %v1128_v26  ;;  %503 = vrot.lane.b32.xlu2 %v1881_v35, %s1125_s3 }
 0x161   :  { %507 = vrot.lane.b32.xlu1 %v1884_v33, %s1125_s3  ;;  %582 = vperm.xlu0 %1086, %v1526_v40  }
 0x162   :  { %v374_v56 = vpop.permute.xlu0 %373  ;;  %v384_v38 = vpop.permute.xlu2 %383 }
 0x163   :  { %v370_v24 = vpop.permute.xlu1 %369  ;;  %v399_v37 = vsel %vm294_vm2, %v368_v31, %v384_v38 }
 0x168   :  { %526 = vperm.xlu2 %1081, %v1483_v61  }
 0x169   :  { %534 = vperm.xlu1 %1083, %v1526_v40   ;;  %1089 = vset.pattern.permute.xlu0 %v1129_v5 }
 0x16a   :  { %v380_v57 = vpop.permute.xlu0 %379  ;;  %v390_v53 = vpop.permute.xlu2 %389  ;;  %634 = vperm.xlu0 %1089, %v1504_v25  }
 0x16b   :  { %v376_v20 = vpop.permute.xlu1 %375  ;;  %v397_v33 = vsel %vm294_vm2, %v364_v47, %v380_v57  ;;  %v1900_v35 = vsel %vm294_vm2, %v374_v56, %v390_v53 }
 0x170   :  { %538 = vperm.xlu2 %1081, %v1504_v25  }
 0x171   :  { %1084 = vset.pattern.permute.xlu1 %v1128_v26 }
 0x172   :  { %574 = vperm.xlu1 %1084, %v1483_v61   ;;  %v386_v38 = vpop.permute.xlu0 %385  ;;  %v396_v60 = vpop.permute.xlu2 %395  ;;  %717 = vrot.lane.b32.xlu0 %v1329_v42, %s1130_s1 }
 0x173   :  { %v382_v27 = vpop.permute.xlu1 %381  ;;  %v1908_v59 = vsel %vm294_vm2, %v370_v24, %v386_v38  ;;  %v411_v53 = vsel %vm294_vm2, %v396_v60, %v376_v20  ;;  %v407_v52 = vsel %vm294_vm2, %v396_v60, %v368_v31  ;;  %v405_v51 = vsel %vm294_vm2, %v396_v60, %v364_v47 }
 0x174   :  { %v1913_v57 = vsel %vm294_vm2, %v1800_v45, %v382_v27  ;;  %v409_v42 = vsel %vm294_vm2, %v396_v60, %v1846_v34  ;;  %v1927_v38 = vsel %vm294_vm2, %v396_v60, %v1800_v45  ;;  %v1931_v27 = vsel %vm294_vm2, %v396_v60, %v374_v56 }
 0x175   :  { %v1935_v50 = vsel %vm294_vm2, %v396_v60, %v370_v24  ;;  %v297_v31 = vsel %vm294_vm2, %v1569_v8, %v1653_v30  ;;  %v1944_v47 = vsel %vm294_vm2, %v396_v60, %v1870_v1  ;;  %v295_v56 = vsel %vm294_vm2, %v1557_v3, %v1598_v13 }
 0x176   :  { %v336_v45 = vmul.f32 %v1760_v9, %v297_v31  ;;  %v307_v24 = vsel %vm294_vm2, %v1688_v19, %v1617_v62  ;;  %v303_v30 = vsel %vm294_vm2, %v1718_v21, %v1557_v3  ;;  %v351_v8 = vadd.f32 %v1775_v22, %v1573_v2 }
 0x177   :  { %v359_v9 = vadd.f32 %v1821_v46, %v1573_v2  ;;  %v332_v44 = vmul.f32 %v1798_v48, %v295_v56  ;;  %v360_v46 = vadd.f32 %v1778_v54, %v1573_v2 }
 0x178   :  { %1085 = vset.pattern.permute.xlu2 %v1128_v26  ;;  %v352_v13 = vadd.f32 %v336_v45, %v1573_v2  ;;  %v331_v45 = vmul.f32 %v1798_v48, %v303_v30  ;;  %v356_v30 = vadd.f32 %v1803_v36, %v1563_v55 }
 0x179   :  { %578 = vperm.xlu2 %1085, %v1511_v23  }
 0x17a   :  { %586 = vperm.xlu1 %1084, %v1504_v25   ;;  %v392_v60 = vpop.permute.xlu0 %391  ;;  %v423_v19 = vpop.permute.xlu2 %422  ;;  %723 = vrot.lane.b32.xlu0 %v1321_v39, %s1130_s1  ;;  %v339_v39 = vmul.f32 %v1798_v48, %v307_v24 }
 0x17b   :  { %v388_v26 = vpop.permute.xlu1 %387  ;;  %v403_v21 = vsel %vm294_vm2, %v376_v20, %v392_v60  ;;  %v433_v3 = vmul.f32 %v423_v19, %v407_v52  ;;  %v434_v31 = vmul.f32 %v423_v19, %v399_v37  ;;  %v441_v22 = vmul.f32 %v423_v19, %v411_v53 }
 0x17c   :  { %v401_v62 = vsel %vm294_vm2, %v1846_v34, %v388_v26  ;;  %v442_v43 = vmul.f32 %v423_v19, %v403_v21  ;;  %v347_v52 = vadd.f32 %v331_v45, %v1563_v55  ;;  %v348_v37 = vadd.f32 %v332_v44, %v1563_v55 }
 0x17d   :  { %v1978_v25 = vadd.f32 %v433_v3, %v351_v8  ;;  %v1980_v20 = vadd.f32 %v434_v31, %v352_v13  ;;  %v1982_v60 = vadd.f32 %v441_v22, %v359_v9  ;;  %v355_v53 = vadd.f32 %v339_v39, %v1563_v55 }
 0x17e   :  { %v1984_v34 = vadd.f32 %v442_v43, %v360_v46  ;;  %v1131_v31 = vmov 5   ;;  %v298_v22 = vsel %vm294_vm2, %v1592_v10, %v1615_v29  ;;  %v1132_v46 = vmov 6  }
 0x17f   :  { %1092 = vset.pattern.permute.xlu0 %v1132_v46  ;;  %v338_v29 = vmul.f32 %v1842_v12, %v298_v22  ;;  %v2931_v22 = vld [vmem:[#allocation18_spill] sm:$0xff] }
 0x181   :  { %1087 = vset.pattern.permute.xlu2 %v1129_v5 }
 0x182   :  { %1088 = vset.pattern.permute.xlu1 %v1129_v5  ;;  %v415_v54 = vpop.permute.xlu0 %414  ;;  %v1989_v56 = vpop.permute.xlu2 %461  ;;  %729 = vrot.lane.b32.xlu0 %v1348_v49, %s1130_s1 }
 0x183   :  { %v394_v2 = vpop.permute.xlu1 %393  ;;  %622 = vperm.xlu2 %1087, %v1483_v61   ;;  %v429_v48 = vmul.f32 %v415_v54, %v405_v51  ;;  %v430_v43 = vmul.f32 %v415_v54, %v397_v33  ;;  %v437_v24 = vmul.f32 %v415_v54, %v409_v42  ;;  %626 = vperm.xlu1 %1088, %v1511_v23  }
 0x184   :  { %v404_v39 = vsel %vm294_vm2, %v1870_v1, %v394_v2  ;;  %v438_v44 = vmul.f32 %v415_v54, %v401_v62  ;;  %v296_v42 = vsel %vm294_vm2, %v1600_v14, %v1625_v16  ;;  %v308_v51 = vsel %vm294_vm2, %v1750_v17, %v1581_v11 }
 0x185   :  { %v2000_v5 = vadd.f32 %v429_v48, %v347_v52  ;;  %v2002_v8 = vadd.f32 %v430_v43, %v348_v37  ;;  %v2004_v13 = vadd.f32 %v437_v24, %v355_v53  ;;  %v334_v1 = vmul.f32 %v1844_v41, %v296_v42  ;;  %v2927_v42 = vld [vmem:[#allocation5_spill] sm:$0xff] }
 0x186   :  { %v2014_v55 = vadd.f32 %v438_v44, %v356_v30  ;;  %v341_v36 = vmul.f32 %v1844_v41, %v308_v51  ;;  %v354_v37 = vadd.f32 %v338_v29, %v1579_v7 }
 0x187   :  { %v350_v26 = vadd.f32 %v334_v1, %v1545_v0 }
 0x188   :  { %v357_v19 = vadd.f32 %v341_v36, %v1545_v0  ;;  %v2928_v36 = vld [vmem:[#allocation16_spill] sm:$0xff] }
 0x18a   :  { %v2018_v33 = vpop.permute.xlu0 %463  ;;  %v2022_v21 = vpop.permute.xlu2 %467  ;;  %735 = vrot.lane.b32.xlu0 %v1368_v58, %s1130_s1 }
 0x18b   :  { %v419_v9 = vpop.permute.xlu1 %418  ;;  %630 = vperm.xlu2 %1087, %v1526_v40   ;;  %1090 = vset.pattern.permute.xlu1 %v1131_v31 }
 0x18c   :  { %v2028_v16 = vmul.f32 %v419_v9, %v1927_v38  ;;  %v432_v17 = vmul.f32 %v419_v9, %v1913_v57  ;;  %v439_v62 = vmul.f32 %v419_v9, %v1931_v27  ;;  %v2033_v3 = vmul.f32 %v419_v9, %v1900_v35  ;;  %670 = vperm.xlu1 %1090, %v1483_v61  }
 0x18d   :  { %v306_v38 = vsel %vm294_vm2, %v1758_v4, %v1592_v10  ;;  %v310_v35 = vsel %vm294_vm2, %v1720_v15, %v1631_v63  ;;  %v362_v15 = vadd.f32 %v1849_v6, %v1579_v7 }
 0x18e   :  { %v337_v57 = vmul.f32 %v1842_v12, %v306_v38  ;;  %v2049_v27 = vadd.f32 %v432_v17, %v350_v26  ;;  %v2051_v45 = vadd.f32 %v439_v62, %v357_v19  ;;  %v345_v52 = vmul.f32 %v1842_v12, %v310_v35  ;;  %v2929_v17 = vld [vmem:[#allocation6_spill] sm:$0xff]  ;;  %v2930_v62 = vld [vmem:[#allocation7_spill] sm:$0xff] }
 0x190   :  { %v353_v10 = vadd.f32 %v337_v57, %v1579_v7  ;;  %v361_v63 = vadd.f32 %v345_v52, %v1579_v7 }
 0x192   :  { %v2056_v4 = vpop.permute.xlu0 %469  ;;  %v2062_v54 = vpop.permute.xlu2 %473  ;;  %741 = vrot.lane.b32.xlu0 %v1389_v18, %s1130_s1 }
 0x193   :  { %v427_v53 = vpop.permute.xlu1 %426  ;;  %1091 = vset.pattern.permute.xlu2 %v1131_v31 }
 0x194   :  { %v435_v12 = vmul.f32 %v427_v53, %v1935_v50  ;;  %v436_v2 = vmul.f32 %v427_v53, %v1908_v59  ;;  %v443_v48 = vmul.f32 %v427_v53, %v1944_v47  ;;  %v444_v43 = vmul.f32 %v427_v53, %v404_v39  ;;  %674 = vperm.xlu2 %1091, %v1511_v23   ;;  %v2926_v39 = vld [vmem:[#allocation23_spill] sm:$0xff] }
 0x195   :  { %678 = vperm.xlu1 %1090, %v1526_v40  }
 0x196   :  { %v2071_v24 = vadd.f32 %v435_v12, %v353_v10  ;;  %v2073_v7 = vadd.f32 %v436_v2, %v354_v37  ;;  %v2075_v6 = vadd.f32 %v444_v43, %v362_v15  ;;  %v2077_v30 = vadd.f32 %v443_v48, %v361_v63  ;;  %v2932_v10 = vld [vmem:[#allocation8_spill] sm:$0xff]  ;;  %v2934_v48 = vld [vmem:[#allocation10_spill] sm:$0xff]  ;;  %v2935_v43 = vld [vmem:[#allocation11_spill] sm:$0xff] }
 0x19a   :  { %v2079_v44 = vpop.permute.xlu0 %475  ;;  %747 = vrot.lane.b32.xlu0 %v1409_v28, %s1130_s1  ;;  %v480_v59 = vpop.permute.xlu2 %479 }
 0x19b   :  { %v466_v50 = vpop.permute.xlu1 %465  ;;  %v2086_v47 = vsel %vm294_vm2, %v2018_v33, %v480_v59  ;;  %v2936_v59 = vld [vmem:[#allocation2_spill] sm:$0xff] }
 0x19c   :  { %682 = vperm.xlu2 %1091, %v2926_v39  }
 0x19d   :  { %719 = vrot.lane.b32.xlu1 %v2927_v42, %s1130_s1 }
 0x19e   :  { %1093 = vset.pattern.permute.xlu1 %v1132_v46 }
 0x1a2   :  { %v482_v51 = vpop.permute.xlu0 %481  ;;  %753 = vrot.lane.b32.xlu0 %v2928_v36, %s1130_s1  ;;  %v486_v9 = vpop.permute.xlu2 %485 }
 0x1a3   :  { %v472_v1 = vpop.permute.xlu1 %471  ;;  %v2095_v26 = vsel %vm294_vm2, %v466_v50, %v482_v51  ;;  %v513_v19 = vsel %vm294_vm2, %v2056_v4, %v486_v9 }
 0x1a4   :  { %721 = vrot.lane.b32.xlu2 %v2929_v17, %s1130_s1 }
 0x1a5   :  { %725 = vrot.lane.b32.xlu1 %v2930_v62, %s1130_s1  ;;  %1094 = vset.pattern.permute.xlu2 %v1132_v46  ;;  %v2933_v46 = vld [vmem:[#allocation9_spill] sm:$0xff] }
 0x1aa   :  { %v488_v31 = vpop.permute.xlu0 %487  ;;  %759 = vrot.lane.b32.xlu0 %v2931_v22, %s1130_s1  ;;  %v492_v38 = vpop.permute.xlu2 %491  ;;  %v2938_v22 = vld [vmem:[#allocation14_spill] sm:$0xff] }
 0x1ab   :  { %v478_v35 = vpop.permute.xlu1 %477  ;;  %v514_v57 = vsel %vm294_vm2, %v472_v1, %v488_v31  ;;  %v516_v29 = vsel %vm294_vm2, %v2079_v44, %v492_v38  ;;  %v2937_v31 = vld [vmem:[#allocation13_spill] sm:$0xff]  ;;  %v2939_v38 = vld [vmem:[#allocation30_spill] sm:$0xff] }
 0x1ac   :  { %v509_v52 = vsel %vm294_vm2, %v1989_v56, %v478_v35  ;;  %727 = vrot.lane.b32.xlu2 %v2932_v10, %s1130_s1  ;;  %v304_v35 = vsel %vm294_vm2, %v2939_v38, %v1600_v14 }
 0x1ad   :  { %731 = vrot.lane.b32.xlu1 %v2933_v46, %s1130_s1 }
 0x1b2   :  { %v494_v37 = vpop.permute.xlu0 %493  ;;  %783 = vperm.xlu0 %1092, %v1483_v61   ;;  %v498_v63 = vpop.permute.xlu2 %497 }
 0x1b3   :  { %v484_v15 = vpop.permute.xlu1 %483  ;;  %v517_v53 = vsel %vm294_vm2, %v494_v37, %v1989_v56  ;;  %v2124_v12 = vsel %vm294_vm2, %v498_v63, %v466_v50  ;;  %v333_v63 = vmul.f32 %v1844_v41, %v304_v35  ;;  %v2941_v35 = vld [vmem:[#allocation15_spill] sm:$0xff] }
 0x1b4   :  { %v512_v2 = vsel %vm294_vm2, %v2022_v21, %v484_v15  ;;  %733 = vrot.lane.b32.xlu2 %v2934_v48, %s1130_s1 }
 0x1b5   :  { %737 = vrot.lane.b32.xlu1 %v2935_v43, %s1130_s1 }
 0x1ba   :  { %v500_v61 = vpop.permute.xlu0 %499  ;;  %832 = vrot.lane.b32.xlu0 %v2936_v59, %s1130_s1  ;;  %v504_v51 = vpop.permute.xlu2 %503 }
 0x1bb   :  { %v490_v56 = vpop.permute.xlu1 %489  ;;  %v520_v50 = vsel %vm294_vm2, %v500_v61, %v2022_v21  ;;  %v522_v36 = vsel %vm294_vm2, %v504_v51, %v472_v1  ;;  %v2940_v21 = vld [vmem:[#allocation34_spill] sm:$0xff] }
 0x1bc   :  { %v2143_v9 = vsel %vm294_vm2, %v2062_v54, %v490_v56  ;;  %739 = vrot.lane.b32.xlu2 %v2937_v31, %s1130_s1  ;;  %v300_v1 = vsel %vm294_vm2, %v1581_v11, %v2940_v21  ;;  %v2162_v61 = vld [vmem:[%s2795_s0 + $0x40] sm:$0xff]  ;;  %v2942_v21 = vld [vmem:[#allocation17_spill] sm:$0xff] }
 0x1bd   :  { %743 = vrot.lane.b32.xlu1 %v2938_v22, %s1130_s1  ;;  %v342_v15 = vmul.f32 %v1844_v41, %v300_v1 }
 0x1c2   :  { %v506_v37 = vpop.permute.xlu0 %505  ;;  %838 = vrot.lane.b32.xlu0 %v2162_v61, %s1130_s1  ;;  %v527_v59 = vpop.permute.xlu2 %526 }
 0x1c3   :  { %v496_v14 = vpop.permute.xlu1 %495  ;;  %v2169_v51 = vsel %vm294_vm2, %v506_v37, %v2062_v54  ;;  %v541_v11 = vmul.f32 %v527_v59, %v517_v53  ;;  %v542_v56 = vmul.f32 %v527_v59, %v509_v52  ;;  %v550_v38 = vmul.f32 %v527_v59, %v513_v19 }
 0x1c4   :  { %v518_v41 = vsel %vm294_vm2, %v496_v14, %v2018_v33  ;;  %745 = vrot.lane.b32.xlu2 %v2941_v35, %s1130_s1  ;;  %v358_v19 = vadd.f32 %v342_v15, %v1545_v0  ;;  %v349_v52 = vadd.f32 %v333_v63, %v1545_v0  ;;  %v2875_v33 = vmov 7  }
 0x1c5   :  { %749 = vrot.lane.b32.xlu1 %v2942_v21, %s1130_s1  ;;  %v2179_v1 = vadd.f32 %v541_v11, %v2000_v5  ;;  %v2182_v28 = vadd.f32 %v542_v56, %v2002_v8  ;;  %v2185_v54 = vadd.f32 %v550_v38, %v2014_v55  ;;  %1097 = vset.pattern.permute.xlu0 %v2875_v33  ;;  %v2195_v5 = vld [vmem:[%s2795_s0 + $0x70] sm:$0xff] }
 0x1c6   :  { %v447_v53 = vadd.f32 %v2028_v16, %v349_v52  ;;  %v456_v37 = vadd.f32 %v2033_v3, %v358_v19  ;;  %v2943_v21 = vld [vmem:[#allocation20_spill] sm:$0xff] }
 0x1ca   :  { %v531_v14 = vpop.permute.xlu0 %530  ;;  %844 = vrot.lane.b32.xlu0 %v2195_v5, %s1130_s1  ;;  %v539_v8 = vpop.permute.xlu2 %538 }
 0x1cb   :  { %v502_v55 = vpop.permute.xlu1 %501  ;;  %v543_v15 = vmul.f32 %v531_v14, %v518_v41  ;;  %v544_v0 = vmul.f32 %v531_v14, %v2086_v47  ;;  %v551_v63 = vmul.f32 %v531_v14, %v522_v36  ;;  %v552_v11 = vmul.f32 %v531_v14, %v514_v57  ;;  %v2944_v47 = vld [vmem:[#allocation19_spill] sm:$0xff]  ;;  %v2946_v14 = vld [vmem:[#allocation21_spill] sm:$0xff] }
 0x1cc   :  { %v547_v56 = vmul.f32 %v539_v8, %v520_v50  ;;  %v548_v16 = vmul.f32 %v539_v8, %v512_v2  ;;  %v556_v38 = vmul.f32 %v539_v8, %v516_v29  ;;  %v521_v3 = vsel %vm294_vm2, %v502_v55, %v2056_v4  ;;  %751 = vrot.lane.b32.xlu2 %v2943_v21, %s1130_s1 }
 0x1cd   :  { %v549_v19 = vmul.f32 %v527_v59, %v521_v3  ;;  %v559_v52 = vadd.f32 %v543_v15, %v447_v53  ;;  %v560_v33 = vadd.f32 %v544_v0, %v2049_v27  ;;  %v567_v41 = vadd.f32 %v551_v63, %v2051_v45  ;;  %755 = vrot.lane.b32.xlu1 %v2944_v47, %s1130_s1  ;;  %v1103_v27 = vld [vmem:[%s2795_s0 + $0x28] sm:$0xff] }
 0x1ce   :  { %v2210_v57 = vadd.f32 %v547_v56, %v2071_v24  ;;  %v2213_v29 = vadd.f32 %v548_v16, %v2073_v7  ;;  %v2216_v4 = vadd.f32 %v556_v38, %v2075_v6  ;;  %v568_v2 = vadd.f32 %v552_v11, %v456_v37  ;;  %v2945_v7 = vld [vmem:[#allocation22_spill] sm:$0xff]  ;;  %v2947_v11 = vld [vmem:[#allocation24_spill] sm:$0xff] }
 0x1cf   :  { %v2219_v50 = vadd.f32 %v549_v19, %v2004_v13 }
 0x1d2   :  { %850 = vrot.lane.b32.xlu0 %v1103_v27, %s1130_s1 }
 0x1d3   :  { %v508_v45 = vpop.permute.xlu1 %507  ;;  %v579_v6 = vpop.permute.xlu2 %578 }
 0x1d4   :  { %v524_v24 = vsel %vm294_vm2, %v508_v45, %v2079_v44  ;;  %757 = vrot.lane.b32.xlu2 %v2945_v7, %s1130_s1  ;;  %v583_v36 = vpop.permute.xlu0 %582  ;;  %v591_v13 = vmul.f32 %v579_v6, %v2927_v42  ;;  %v592_v53 = vmul.f32 %v579_v6, %v1368_v58  ;;  %v599_v37 = vmul.f32 %v579_v6, %v2932_v10  ;;  %v2250_v58 = vld [vmem:[%s2795_s0 + $0x58] sm:$0xff]  ;;  %v2949_v45 = vld [vmem:[#allocation4_spill] sm:$0xff] }
 0x1d5   :  { %v555_v59 = vmul.f32 %v539_v8, %v524_v24  ;;  %761 = vrot.lane.b32.xlu1 %v2946_v14, %s1130_s1  ;;  %v600_v55 = vmul.f32 %v579_v6, %v2938_v22  ;;  %v602_v19 = vmul.f32 %v583_v36, %v2941_v35 }
 0x1d6   :  { %v2239_v44 = vadd.f32 %v591_v13, %v559_v52  ;;  %v2241_v0 = vadd.f32 %v592_v53, %v560_v33  ;;  %v2243_v63 = vadd.f32 %v599_v37, %v567_v41  ;;  %v1108_v13 = vld [vmem:[%s2795_s0 + $0x20] sm:$0xff] }
 0x1d7   :  { %v2237_v15 = vadd.f32 %v555_v59, %v2077_v30  ;;  %v2245_v8 = vadd.f32 %v600_v55, %v568_v2 }
 0x1da   :  { %856 = vrot.lane.b32.xlu0 %v2250_v58, %s1130_s1 }
 0x1db   :  { %v535_v42 = vpop.permute.xlu1 %534 }
 0x1dc   :  { %v545_v30 = vmul.f32 %v535_v42, %v2124_v12  ;;  %v546_v10 = vmul.f32 %v535_v42, %v2095_v26  ;;  %v553_v22 = vmul.f32 %v535_v42, %v2169_v51  ;;  %v554_v33 = vmul.f32 %v535_v42, %v2143_v9  ;;  %763 = vrot.lane.b32.xlu2 %v2947_v11, %s1130_s1  ;;  %v635_v16 = vpop.permute.xlu0 %634 }
 0x1dd   :  { %787 = vperm.xlu1 %1093, %v1511_v23   ;;  %v623_v56 = vpop.permute.xlu2 %622  ;;  %v593_v26 = vmul.f32 %v583_v36, %v2929_v17  ;;  %v594_v51 = vmul.f32 %v583_v36, %v2935_v43  ;;  %v601_v9 = vmul.f32 %v583_v36, %v1348_v49  ;;  %v2284_v43 = vld [vmem:[%s2795_s0 + $0x48] sm:$0xff] }
 0x1de   :  { %v561_v38 = vadd.f32 %v545_v30, %v1978_v25  ;;  %v562_v3 = vadd.f32 %v546_v10, %v1980_v20  ;;  %v569_v21 = vadd.f32 %v553_v22, %v1982_v60  ;;  %v570_v12 = vadd.f32 %v554_v33, %v1984_v34  ;;  %v1105_v20 = vld [vmem:[%s2795_s0] sm:$0xff]  ;;  %v2277_v34 = vld [vmem:[%s2795_s0 + $0x8] sm:$0xff] }
 0x1df   :  { %v2948_v25 = vmov 0.0   ;;  %v637_v60 = vmul.f32 %v1105_v20, %v623_v56  ;;  %v638_v49 = vmul.f32 %v2277_v34, %v623_v56  ;;  %v645_v17 = vmul.f32 %v2162_v61, %v623_v56 }
 0x1e0   :  { %v609_v52 = vadd.f32 %v593_v26, %v561_v38  ;;  %v610_v23 = vadd.f32 %v594_v51, %v562_v3  ;;  %v617_v41 = vadd.f32 %v601_v9, %v569_v21  ;;  %v618_v47 = vadd.f32 %v602_v19, %v570_v12  ;;  %v2344_v12 = vld [vmem:[%s2795_s0 + $0x78] sm:$0xff]  ;;  %v2950_v51 = vld [vmem:[#allocation3_spill] sm:$0xff] }
 0x1e1   :  { %v646_v35 = vmul.f32 %v2284_v43, %v623_v56  ;;  %v651_v21 = vmul.f32 %v2195_v5, %v635_v16 }
 0x1e2   :  { %862 = vrot.lane.b32.xlu0 %v2948_v25, %s1130_s1  ;;  %v2952_v25 = vmov 7  }
 0x1e4   :  { %791 = vperm.xlu2 %1094, %v1526_v40   ;;  %v575_v2 = vpop.permute.xlu1 %574  ;;  %v2293_v59 = vpop.permute.xlu0 %717 }
 0x1e5   :  { %795 = vperm.xlu1 %1093, %v2926_v39   ;;  %v589_v24 = vmul.f32 %v575_v2, %v2949_v45  ;;  %v590_v7 = vmul.f32 %v575_v2, %v2934_v48  ;;  %v597_v6 = vmul.f32 %v575_v2, %v2930_v62  ;;  %v598_v61 = vmul.f32 %v575_v2, %v1389_v18  ;;  %v631_v36 = vpop.permute.xlu2 %630  ;;  %v2301_v39 = vld [vmem:[%s2795_s0 + $0x60] sm:$0xff]  ;;  %v2307_v18 = vld [vmem:[%s2795_s0 + $0x68] sm:$0xff]  ;;  %v2953_v2 = vld [vmem:[#allocation32_spill] sm:$0xff] }
 0x1e6   :  { %v641_v53 = vmul.f32 %v1108_v13, %v631_v36  ;;  %v642_v37 = vmul.f32 %v1103_v27, %v631_v36  ;;  %v649_v48 = vmul.f32 %v2301_v39, %v631_v36  ;;  %v650_v62 = vmul.f32 %v2307_v18, %v631_v36  ;;  %v1114_v45 = vld [vmem:[%s2795_s0 + $0x50] sm:$0xff] }
 0x1e7   :  { %v605_v14 = vadd.f32 %v589_v24, %v2179_v1  ;;  %v606_v55 = vadd.f32 %v590_v7, %v2182_v28  ;;  %v613_v27 = vadd.f32 %v597_v6, %v2219_v50  ;;  %v614_v42 = vadd.f32 %v598_v61, %v2185_v54  ;;  %v1111_v28 = vld [vmem:[%s2795_s0 + $0x30] sm:$0xff]  ;;  %v2337_v50 = vld [vmem:[%s2795_s0 + $0x38] sm:$0xff]  ;;  %v2957_v61 = vld [vmem:[#allocation35_spill] sm:$0xff] }
 0x1e8   :  { %v2314_v30 = vadd.f32 %v641_v53, %v609_v52  ;;  %v2316_v10 = vadd.f32 %v642_v37, %v610_v23  ;;  %v2318_v22 = vadd.f32 %v649_v48, %v617_v41  ;;  %v2320_v33 = vadd.f32 %v650_v62, %v618_v47  ;;  %v2951_v23 = vld [vmem:[#allocation12_spill] sm:$0xff]  ;;  %v2956_v7 = vld [vmem:[#allocation33_spill] sm:$0xff] }
 0x1e9   :  { %v2322_v11 = vadd.f32 %v637_v60, %v605_v14  ;;  %v2324_v56 = vadd.f32 %v645_v17, %v613_v27  ;;  %v2326_v38 = vadd.f32 %v646_v35, %v614_v42  ;;  %v2328_v1 = vadd.f32 %v638_v49, %v606_v55  ;;  %v1115_v37 = vld [vmem:[%s2795_s0 + $0x10] sm:$0xff]  ;;  %v1116_v62 = vld [vmem:[%s2795_s0 + $0x18] sm:$0xff] }
 0x1ea   :  { %889 = vperm.xlu0 %1097, %v1526_v40   ;;  %v643_v54 = vmul.f32 %v1111_v28, %v635_v16  ;;  %v644_v3 = vmul.f32 %v2337_v50, %v635_v16  ;;  %v652_v40 = vmul.f32 %v2344_v12, %v635_v16 }
 0x1ec   :  { %830 = vrot.lane.b32.xlu2 %v1105_v20, %s1130_s1  ;;  %v587_v26 = vpop.permute.xlu1 %586  ;;  %v2353_v41 = vpop.permute.xlu0 %723 }
 0x1ed   :  { %834 = vrot.lane.b32.xlu1 %v1108_v13, %s1130_s1  ;;  %v595_v9 = vmul.f32 %v587_v26, %v2950_v51  ;;  %v596_v19 = vmul.f32 %v587_v26, %v2937_v31  ;;  %v603_v52 = vmul.f32 %v587_v26, %v2933_v46  ;;  %v604_v5 = vmul.f32 %v587_v26, %v2951_v23 }
 0x1ee   :  { %v675_v47 = vpop.permute.xlu2 %674  ;;  %1095 = vset.pattern.permute.xlu1 %v2952_v25  ;;  %1096 = vset.pattern.permute.xlu2 %v2952_v25  ;;  %v2961_v25 = vld [vmem:[#allocation36_spill] sm:$0xff] }
 0x1ef   :  { %v611_v16 = vadd.f32 %v595_v9, %v2210_v57  ;;  %v612_v20 = vadd.f32 %v596_v19, %v2213_v29  ;;  %v619_v60 = vadd.f32 %v603_v52, %v2237_v15  ;;  %v620_v49 = vadd.f32 %v604_v5, %v2216_v4  ;;  %v2954_v29 = vld [vmem:[#allocation25_spill] sm:$0xff]  ;;  %v2955_v4 = vld [vmem:[#allocation39_spill] sm:$0xff] }
 0x1f0   :  { %v687_v15 = vmul.f32 %v675_v47, %v2954_v29  ;;  %v688_v24 = vmul.f32 %v675_v47, %v2955_v4  ;;  %v695_v6 = vmul.f32 %v675_v47, %v2956_v7  ;;  %v696_v36 = vmul.f32 %v675_v47, %v2957_v61 }
 0x1f1   :  { %v659_v31 = vadd.f32 %v643_v54, %v611_v16  ;;  %v660_v17 = vadd.f32 %v644_v3, %v612_v20  ;;  %v667_v46 = vadd.f32 %v651_v21, %v619_v60  ;;  %v668_v35 = vadd.f32 %v652_v40, %v620_v49  ;;  %v2959_v3 = vld [vmem:[#allocation27_spill] sm:$0xff]  ;;  %v2960_v40 = vld [vmem:[#allocation45_spill] sm:$0xff]  ;;  %v2962_v49 = vld [vmem:[#allocation28_spill] sm:$0xff] }
 0x1f2   :  { %934 = vrot.lane.b32.xlu0 %v2953_v2, %s1130_s1 }
 0x1f4   :  { %836 = vrot.lane.b32.xlu2 %v1111_v28, %s1130_s1  ;;  %v2368_v57 = vpop.permute.xlu0 %729  ;;  %v2958_v28 = vld [vmem:[#allocation40_spill] sm:$0xff] }
 0x1f5   :  { %840 = vrot.lane.b32.xlu1 %v1114_v45, %s1130_s1  ;;  %v627_v13 = vpop.permute.xlu1 %626 }
 0x1f6   :  { %v683_v53 = vpop.permute.xlu2 %682  ;;  %v639_v48 = vmul.f32 %v1115_v37, %v627_v13  ;;  %v640_v14 = vmul.f32 %v1116_v62, %v627_v13  ;;  %v647_v55 = vmul.f32 %v1114_v45, %v627_v13  ;;  %v648_v27 = vmul.f32 %v2250_v58, %v627_v13  ;;  %v2965_v45 = vld [vmem:[#allocation42_spill] sm:$0xff]  ;;  %v2967_v37 = vld [vmem:[#allocation31_spill] sm:$0xff] }
 0x1f7   :  { %v691_v42 = vmul.f32 %v683_v53, %v2953_v2  ;;  %v692_v54 = vmul.f32 %v683_v53, %v2958_v28  ;;  %v699_v21 = vmul.f32 %v683_v53, %v2959_v3  ;;  %v700_v26 = vmul.f32 %v683_v53, %v2960_v40  ;;  %v2966_v53 = vld [vmem:[#allocation29_spill] sm:$0xff] }
 0x1f8   :  { %v655_v51 = vadd.f32 %v639_v48, %v2239_v44  ;;  %v656_v9 = vadd.f32 %v640_v14, %v2241_v0  ;;  %v663_v19 = vadd.f32 %v647_v55, %v2243_v63  ;;  %v664_v52 = vadd.f32 %v648_v27, %v2245_v8 }
 0x1f9   :  { %v2389_v23 = vadd.f32 %v691_v42, %v659_v31  ;;  %v2391_v5 = vadd.f32 %v692_v54, %v660_v17  ;;  %v2393_v58 = vadd.f32 %v699_v21, %v667_v46  ;;  %v2395_v47 = vadd.f32 %v700_v26, %v668_v35  ;;  %v2963_v17 = vld [vmem:[#allocation37_spill] sm:$0xff]  ;;  %v2964_v35 = vld [vmem:[#allocation26_spill] sm:$0xff] }
 0x1fa   :  { %940 = vrot.lane.b32.xlu0 %v2961_v25, %s1130_s1  ;;  %v2399_v16 = vadd.f32 %v687_v15, %v655_v51  ;;  %v2401_v44 = vadd.f32 %v688_v24, %v656_v9  ;;  %v2403_v0 = vadd.f32 %v695_v6, %v663_v19  ;;  %v2405_v63 = vadd.f32 %v696_v36, %v664_v52  ;;  %v2490_v51 = vld [vmem:[%s2798_s2 + $0x18] sm:$0xff] }
 0x1fc   :  { %842 = vrot.lane.b32.xlu2 %v2301_v39, %s1130_s1  ;;  %v2411_v8 = vpop.permute.xlu0 %735 }
 0x1fd   :  { %846 = vrot.lane.b32.xlu1 %v2277_v34, %s1130_s1 }
 0x1fe   :  { %v2413_v20 = vpop.permute.xlu2 %721  ;;  %v671_v60 = vpop.permute.xlu1 %670 }
 0x1ff   :  { %v685_v31 = vmul.f32 %v671_v60, %v2962_v49  ;;  %v686_v46 = vmul.f32 %v671_v60, %v2963_v17  ;;  %v693_v2 = vmul.f32 %v671_v60, %v2964_v35  ;;  %v694_v15 = vmul.f32 %v671_v60, %v2965_v45  ;;  %v2970_v60 = vld [vmem:[#allocation49_spill] sm:$0xff] }
 0x201   :  { %v701_v24 = vadd.f32 %v685_v31, %v2322_v11  ;;  %v709_v39 = vadd.f32 %v693_v2, %v2324_v56  ;;  %v2422_v6 = vadd.f32 %v694_v15, %v2326_v38  ;;  %v2425_v34 = vadd.f32 %v686_v46, %v2328_v1  ;;  %v2968_v1 = vld [vmem:[#allocation43_spill] sm:$0xff] }
 0x202   :  { %946 = vrot.lane.b32.xlu0 %v2955_v4, %s1130_s1 }
 0x204   :  { %848 = vrot.lane.b32.xlu2 %v1116_v62, %s1130_s1  ;;  %v742_v36 = vpop.permute.xlu0 %741  ;;  %v1134_v62 = vmov 8  }
 0x205   :  { %852 = vrot.lane.b32.xlu1 %v2337_v50, %s1130_s1  ;;  %1098 = vset.pattern.permute.xlu0 %v1134_v62 }
 0x206   :  { %v2432_v13 = vpop.permute.xlu2 %727 }
 0x207   :  { %v679_v11 = vpop.permute.xlu1 %678 }
 0x208   :  { %v689_v56 = vmul.f32 %v679_v11, %v2966_v53  ;;  %v690_v38 = vmul.f32 %v679_v11, %v2967_v37  ;;  %v697_v48 = vmul.f32 %v679_v11, %v2961_v25  ;;  %v698_v14 = vmul.f32 %v679_v11, %v2968_v1 }
 0x20a   :  { %v2439_v55 = vadd.f32 %v689_v56, %v2314_v30  ;;  %v2442_v4 = vadd.f32 %v690_v38, %v2316_v10  ;;  %v2445_v50 = vadd.f32 %v697_v48, %v2318_v22  ;;  %v2448_v27 = vadd.f32 %v698_v14, %v2320_v33  ;;  %952 = vrot.lane.b32.xlu0 %v2965_v45, %s1130_s1 }
 0x20c   :  { %854 = vrot.lane.b32.xlu2 %v2284_v43, %s1130_s1  ;;  %v748_v30 = vpop.permute.xlu0 %747  ;;  %v1117_v43 = vld [vmem:[%s2798_s2] sm:$0xff] }
 0x20d   :  { %858 = vrot.lane.b32.xlu1 %v2307_v18, %s1130_s1 }
 0x20e   :  { %v734_v10 = vpop.permute.xlu2 %733 }
 0x20f   :  { %v774_v22 = vsel %vm765_vm3, %v2293_v59, %v734_v10  ;;  %v720_v42 = vpop.permute.xlu1 %719 }
 0x210   :  { %v2463_v33 = vsel %vm765_vm3, %v720_v42, %v2411_v8 }
 0x212   :  { %958 = vrot.lane.b32.xlu0 %v2960_v40, %s1130_s1  ;;  %v2969_v40 = vld [vmem:[#allocation47_spill] sm:$0xff] }
 0x214   :  { %860 = vrot.lane.b32.xlu2 %v2344_v12, %s1130_s1  ;;  %v754_v18 = vpop.permute.xlu0 %753  ;;  %v2484_v12 = vld [vmem:[%s2798_s2 + $0x8] sm:$0xff] }
 0x215   :  { %881 = vperm.xlu1 %1095, %v1117_v43  }
 0x216   :  { %v740_v54 = vpop.permute.xlu2 %739 }
 0x217   :  { %v2475_v59 = vsel %vm765_vm3, %v2353_v41, %v740_v54  ;;  %v726_v21 = vpop.permute.xlu1 %725 }
 0x218   :  { %v778_v26 = vsel %vm765_vm3, %v726_v21, %v742_v36 }
 0x21a   :  { %964 = vrot.lane.b32.xlu0 %v2969_v40, %s1130_s1 }
 0x21c   :  { %885 = vperm.xlu2 %1096, %v2484_v12   ;;  %v760_v41 = vpop.permute.xlu0 %759 }
 0x21d   :  { %893 = vperm.xlu1 %1095, %v2490_v51  }
 0x21e   :  { %v746_v9 = vpop.permute.xlu2 %745 }
 0x21f   :  { %v780_v19 = vsel %vm765_vm3, %v2368_v57, %v746_v9  ;;  %v732_v52 = vpop.permute.xlu1 %731 }
 0x220   :  { %v2498_v25 = vsel %vm765_vm3, %v732_v52, %v748_v30 }
 0x222   :  { %970 = vrot.lane.b32.xlu0 %v2970_v60, %s1130_s1 }
 0x224   :  { %928 = vrot.lane.b32.xlu2 %v2962_v49, %s1130_s1  ;;  %v784_v31 = vpop.permute.xlu0 %783 }
 0x225   :  { %930 = vrot.lane.b32.xlu1 %v2954_v29, %s1130_s1  ;;  %1100 = vset.pattern.permute.xlu2 %v1134_v62  ;;  %v798_v46 = vmul.f32 %v784_v31, %v774_v22  ;;  %v806_v2 = vmul.f32 %v784_v31, %v778_v26 }
 0x226   :  { %v752_v45 = vpop.permute.xlu2 %751  ;;  %1099 = vset.pattern.permute.xlu1 %v1134_v62 }
 0x227   :  { %v767_v57 = vsel %vm765_vm3, %v2411_v8, %v752_v45  ;;  %v738_v15 = vpop.permute.xlu1 %737  ;;  %v2509_v11 = vadd.f32 %v798_v46, %v701_v24  ;;  %v2511_v56 = vadd.f32 %v806_v2, %v709_v39 }
 0x228   :  { %v768_v49 = vsel %vm765_vm3, %v738_v15, %v754_v18  ;;  %v776_v29 = vsel %vm765_vm3, %v2413_v20, %v738_v15  ;;  %v2973_v15 = vld [vmem:[#allocation41_spill] sm:$0xff] }
 0x22a   :  { %993 = vperm.xlu0 %1098, %v1117_v43  }
 0x22c   :  { %932 = vrot.lane.b32.xlu2 %v2966_v53, %s1130_s1  ;;  %v2522_v8 = vpop.permute.xlu0 %832 }
 0x22d   :  { %936 = vrot.lane.b32.xlu1 %v2964_v35, %s1130_s1 }
 0x22e   :  { %v758_v24 = vpop.permute.xlu2 %757 }
 0x22f   :  { %v770_v39 = vsel %vm765_vm3, %v742_v36, %v758_v24  ;;  %v744_v38 = vpop.permute.xlu1 %743 }
 0x230   :  { %v807_v48 = vmul.f32 %v784_v31, %v770_v39  ;;  %v771_v14 = vsel %vm765_vm3, %v744_v38, %v760_v41  ;;  %v779_v20 = vsel %vm765_vm3, %v2432_v13, %v744_v38 }
 0x232   :  { %v2532_v53 = vadd.f32 %v807_v48, %v2422_v6 }
 0x234   :  { %938 = vrot.lane.b32.xlu2 %v2956_v7, %s1130_s1  ;;  %v2538_v35 = vpop.permute.xlu0 %838 }
 0x235   :  { %942 = vrot.lane.b32.xlu1 %v2959_v3, %s1130_s1 }
 0x236   :  { %v764_v36 = vpop.permute.xlu2 %763 }
 0x237   :  { %v773_v62 = vsel %vm765_vm3, %v748_v30, %v764_v36  ;;  %v750_v22 = vpop.permute.xlu1 %749 }
 0x238   :  { %v766_v42 = vsel %vm765_vm3, %v734_v10, %v750_v22 }
 0x239   :  { %v799_v13 = vmul.f32 %v784_v31, %v766_v42 }
 0x23b   :  { %v2545_v6 = vadd.f32 %v799_v13, %v2425_v34 }
 0x23c   :  { %944 = vrot.lane.b32.xlu2 %v2963_v17, %s1130_s1  ;;  %v2551_v7 = vpop.permute.xlu0 %844 }
 0x23d   :  { %948 = vrot.lane.b32.xlu1 %v2967_v37, %s1130_s1 }
 0x23e   :  { %v792_v3 = vpop.permute.xlu2 %791 }
 0x23f   :  { %v802_v43 = vmul.f32 %v792_v3, %v776_v29  ;;  %v803_v18 = vmul.f32 %v792_v3, %v768_v49  ;;  %v810_v30 = vmul.f32 %v792_v3, %v780_v19  ;;  %v756_v21 = vpop.permute.xlu1 %755 }
 0x240   :  { %v769_v10 = vsel %vm765_vm3, %v740_v54, %v756_v21 }
 0x241   :  { %v819_v26 = vadd.f32 %v803_v18, %v2442_v4  ;;  %v818_v34 = vadd.f32 %v802_v43, %v2439_v55  ;;  %v2558_v40 = vadd.f32 %v810_v30, %v2445_v50  ;;  %v2971_v55 = vld [vmem:[#allocation38_spill] sm:$0xff] }
 0x244   :  { %950 = vrot.lane.b32.xlu2 %v2958_v28, %s1130_s1  ;;  %v851_v17 = vpop.permute.xlu0 %850 }
 0x245   :  { %954 = vrot.lane.b32.xlu1 %v2957_v61, %s1130_s1 }
 0x246   :  { %v2564_v37 = vpop.permute.xlu2 %830 }
 0x247   :  { %v762_v41 = vpop.permute.xlu1 %761 }
 0x248   :  { %v772_v54 = vsel %vm765_vm3, %v746_v9, %v762_v41 }
 0x249   :  { %v811_v19 = vmul.f32 %v792_v3, %v772_v54  ;;  %v2976_v3 = vld [vmem:[#allocation50_spill] sm:$0xff] }
 0x24b   :  { %v2569_v4 = vadd.f32 %v811_v19, %v2448_v27 }
 0x24c   :  { %956 = vrot.lane.b32.xlu2 %v2968_v1, %s1130_s1  ;;  %v857_v28 = vpop.permute.xlu0 %856  ;;  %v2972_v1 = vld [vmem:[#allocation46_spill] sm:$0xff] }
 0x24d   :  { %960 = vrot.lane.b32.xlu1 %v2971_v55, %s1130_s1 }
 0x24e   :  { %v837_v50 = vpop.permute.xlu2 %836 }
 0x24f   :  { %v788_v61 = vpop.permute.xlu1 %787 }
 0x250   :  { %v800_v52 = vmul.f32 %v788_v61, %v2463_v33  ;;  %v801_v60 = vmul.f32 %v788_v61, %v767_v57  ;;  %v808_v31 = vmul.f32 %v788_v61, %v779_v20  ;;  %v809_v46 = vmul.f32 %v788_v61, %v771_v14  ;;  %v2974_v20 = vld [vmem:[#allocation48_spill] sm:$0xff] }
 0x252   :  { %v816_v9 = vadd.f32 %v800_v52, %v2399_v16  ;;  %v817_v2 = vadd.f32 %v801_v60, %v2401_v44  ;;  %v824_v27 = vadd.f32 %v808_v31, %v2403_v0  ;;  %v825_v45 = vadd.f32 %v809_v46, %v2405_v63 }
 0x254   :  { %962 = vrot.lane.b32.xlu2 %v2972_v1, %s1130_s1  ;;  %v863_v49 = vpop.permute.xlu0 %862 }
 0x255   :  { %966 = vrot.lane.b32.xlu1 %v2973_v15, %s1130_s1  ;;  %v866_v33 = vsel %vm765_vm3, %v851_v17, %v863_v49  ;;  %v869_v16 = vsel %vm765_vm3, %v857_v28, %v863_v49 }
 0x256   :  { %v843_v29 = vpop.permute.xlu2 %842 }
 0x257   :  { %v796_v57 = vpop.permute.xlu1 %795 }
 0x258   :  { %v804_v44 = vmul.f32 %v796_v57, %v2475_v59  ;;  %v805_v0 = vmul.f32 %v796_v57, %v769_v10  ;;  %v812_v63 = vmul.f32 %v796_v57, %v2498_v25  ;;  %v813_v24 = vmul.f32 %v796_v57, %v773_v62  ;;  %v2975_v59 = vld [vmem:[#allocation44_spill] sm:$0xff] }
 0x259   :  { %v1120_v10 = vld [vmem:[%s2798_s2 + $0x10] sm:$0xff] }
 0x25a   :  { %v2591_v39 = vadd.f32 %v804_v44, %v2389_v23  ;;  %v2594_v38 = vadd.f32 %v805_v0, %v2391_v5  ;;  %v2597_v48 = vadd.f32 %v812_v63, %v2393_v58  ;;  %v2600_v14 = vadd.f32 %v813_v24, %v2395_v47 }
 0x25c   :  { %968 = vrot.lane.b32.xlu2 %v2974_v20, %s1130_s1  ;;  %v890_v25 = vpop.permute.xlu0 %889 }
 0x25d   :  { %972 = vrot.lane.b32.xlu1 %v2975_v59, %s1130_s1  ;;  %v901_v36 = vmul.f32 %v890_v25, %v866_v33 }
 0x25e   :  { %v849_v62 = vpop.permute.xlu2 %848 }
 0x25f   :  { %v865_v23 = vsel %vm765_vm3, %v849_v62, %v863_v49  ;;  %v873_v5 = vsel %vm765_vm3, %v2522_v8, %v849_v62  ;;  %v835_v58 = vpop.permute.xlu1 %834  ;;  %v2613_v22 = vadd.f32 %v901_v36, %v819_v26 }
 0x260   :  { %v874_v47 = vsel %vm765_vm3, %v835_v58, %v851_v17 }
 0x261   :  { %v900_v42 = vmul.f32 %v890_v25, %v874_v47 }
 0x263   :  { %v2615_v13 = vadd.f32 %v900_v42, %v818_v34 }
 0x264   :  { %974 = vrot.lane.b32.xlu2 %v2976_v3, %s1130_s1  ;;  %v2620_v43 = vpop.permute.xlu0 %934 }
 0x265   :  { %997 = vperm.xlu1 %1099, %v2484_v12  }
 0x266   :  { %v855_v18 = vpop.permute.xlu2 %854 }
 0x267   :  { %v868_v8 = vsel %vm765_vm3, %v855_v18, %v863_v49  ;;  %v841_v30 = vpop.permute.xlu1 %840 }
 0x268   :  { %v877_v21 = vsel %vm765_vm3, %v841_v30, %v857_v28 }
 0x26c   :  { %1001 = vperm.xlu2 %1100, %v1120_v10   ;;  %v2630_v26 = vpop.permute.xlu0 %940 }
 0x26d   :  { %1005 = vperm.xlu1 %1099, %v2490_v51  }
 0x26e   :  { %v861_v12 = vpop.permute.xlu2 %860 }
 0x26f   :  { %v871_v34 = vsel %vm765_vm3, %v861_v12, %v863_v49  ;;  %v879_v17 = vsel %vm765_vm3, %v2551_v7, %v861_v12  ;;  %v847_v41 = vpop.permute.xlu1 %846 }
 0x270   :  { %v864_v54 = vsel %vm765_vm3, %v847_v41, %v863_v49 }
 0x274   :  { %v2639_v19 = vpop.permute.xlu0 %946 }
 0x276   :  { %v886_v55 = vpop.permute.xlu2 %885 }
 0x277   :  { %v898_v28 = vmul.f32 %v886_v55, %v873_v5  ;;  %v899_v61 = vmul.f32 %v886_v55, %v865_v23  ;;  %v906_v51 = vmul.f32 %v886_v55, %v877_v21  ;;  %v907_v52 = vmul.f32 %v886_v55, %v869_v16  ;;  %v853_v60 = vpop.permute.xlu1 %852 }
 0x278   :  { %v867_v31 = vsel %vm765_vm3, %v853_v60, %v863_v49  ;;  %v875_v46 = vsel %vm765_vm3, %v837_v50, %v853_v60 }
 0x279   :  { %v2645_v1 = vadd.f32 %v898_v28, %v816_v9  ;;  %v2647_v7 = vadd.f32 %v899_v61, %v817_v2  ;;  %v2649_v15 = vadd.f32 %v906_v51, %v824_v27  ;;  %v2651_v33 = vadd.f32 %v907_v52, %v825_v45 }
 0x27a   :  { %v876_v45 = vsel %vm765_vm3, %v2538_v35, %v855_v18 }
 0x27c   :  { %v953_v57 = vpop.permute.xlu0 %952 }
 0x27e   :  { %v929_v44 = vpop.permute.xlu2 %928 }
 0x27f   :  { %v859_v0 = vpop.permute.xlu1 %858 }
 0x280   :  { %v870_v16 = vsel %vm765_vm3, %v859_v0, %v863_v49  ;;  %v878_v63 = vsel %vm765_vm3, %v843_v29, %v859_v0  ;;  %v872_v49 = vsel %vm765_vm3, %v2564_v37, %v847_v41 }
 0x281   :  { %v908_v24 = vmul.f32 %v890_v25, %v878_v63  ;;  %v909_v20 = vmul.f32 %v890_v25, %v870_v16 }
 0x283   :  { %v2658_v50 = vadd.f32 %v908_v24, %v2558_v40  ;;  %v2661_v9 = vadd.f32 %v909_v20, %v2569_v4 }
 0x284   :  { %v2663_v2 = vpop.permute.xlu0 %958 }
 0x286   :  { %v933_v27 = vpop.permute.xlu2 %932 }
 0x287   :  { %v882_v29 = vpop.permute.xlu1 %881 }
 0x288   :  { %v896_v59 = vmul.f32 %v882_v29, %v872_v49  ;;  %v897_v25 = vmul.f32 %v882_v29, %v864_v54  ;;  %v904_v36 = vmul.f32 %v882_v29, %v876_v45  ;;  %v905_v40 = vmul.f32 %v882_v29, %v868_v8 }
 0x28a   :  { %v912_v62 = vadd.f32 %v896_v59, %v2509_v11  ;;  %v920_v4 = vadd.f32 %v904_v36, %v2511_v56  ;;  %v921_v23 = vadd.f32 %v905_v40, %v2532_v53  ;;  %v913_v5 = vadd.f32 %v897_v25, %v2545_v6 }
 0x28c   :  { %v965_v58 = vpop.permute.xlu0 %964 }
 0x28e   :  { %v2675_v47 = vpop.permute.xlu2 %938 }
 0x28f   :  { %v894_v35 = vpop.permute.xlu1 %893 }
 0x290   :  { %v902_v42 = vmul.f32 %v894_v35, %v875_v46  ;;  %v903_v3 = vmul.f32 %v894_v35, %v867_v31  ;;  %v910_v37 = vmul.f32 %v894_v35, %v879_v17  ;;  %v911_v18 = vmul.f32 %v894_v35, %v871_v34 }
 0x292   :  { %v2678_v30 = vadd.f32 %v902_v42, %v2591_v39  ;;  %v2681_v8 = vadd.f32 %v903_v3, %v2594_v38  ;;  %v2684_v11 = vadd.f32 %v910_v37, %v2597_v48  ;;  %v2687_v56 = vadd.f32 %v911_v18, %v2600_v14 }
 0x294   :  { %v971_v53 = vpop.permute.xlu0 %970 }
 0x296   :  { %v945_v6 = vpop.permute.xlu2 %944 }
 0x297   :  { %v931_v21 = vpop.permute.xlu1 %930  ;;  %v984_v10 = vsel %vm765_vm3, %v929_v44, %v945_v6 }
 0x29c   :  { %v994_v12 = vpop.permute.xlu0 %993 }
 0x29d   :  { %v1008_v34 = vmul.f32 %v994_v12, %v984_v10 }
 0x29e   :  { %v2691_v17 = vpop.permute.xlu2 %950 }
 0x29f   :  { %v2697_v39 = vsel %vm765_vm3, %v2620_v43, %v2691_v17  ;;  %v937_v38 = vpop.permute.xlu1 %936  ;;  %v1024_v48 = vadd.f32 %v1008_v34, %v912_v62 }
 0x2a0   :  { %v988_v14 = vsel %vm765_vm3, %v937_v38, %v953_v57 }
 0x2a1   :  { %v1016_v41 = vmul.f32 %v994_v12, %v988_v14  ;;  %1040 = vst [vmem:[%s2799_s4] sm:$0xff] %v1024_v48 }
 0x2a3   :  { %v1032_v54 = vadd.f32 %v1016_v41, %v920_v4 }
 0x2a5   :  { %1048 = vst [vmem:[%s2799_s4 + $0x40] sm:$0xff] %v1032_v54 }
 0x2a6   :  { %v957_v55 = vpop.permute.xlu2 %956 }
 0x2a7   :  { %v943_v28 = vpop.permute.xlu1 %942 }
 0x2ae   :  { %v963_v61 = vpop.permute.xlu2 %962 }
 0x2af   :  { %v949_v43 = vpop.permute.xlu1 %948 }
 0x2b0   :  { %v978_v20 = vsel %vm765_vm3, %v949_v43, %v965_v58  ;;  %v986_v45 = vsel %vm765_vm3, %v933_v27, %v949_v43 }
 0x2b6   :  { %v969_v51 = vpop.permute.xlu2 %968 }
 0x2b7   :  { %v980_v52 = vsel %vm765_vm3, %v953_v57, %v969_v51  ;;  %v955_v60 = vpop.permute.xlu1 %954  ;;  %v990_v57 = vsel %vm765_vm3, %v2630_v26, %v957_v55 }
 0x2b8   :  { %v1017_v31 = vmul.f32 %v994_v12, %v980_v52  ;;  %v989_v58 = vsel %vm765_vm3, %v2675_v47, %v955_v60 }
 0x2ba   :  { %v1033_v46 = vadd.f32 %v1017_v31, %v921_v23  ;;  %v977_v23 = vsel %vm765_vm3, %v2639_v19, %v963_v61 }
 0x2bc   :  { %1049 = vst [vmem:[%s2799_s4 + $0x48] sm:$0xff] %v1033_v46 }
 0x2be   :  { %v975_v44 = vpop.permute.xlu2 %974 }
 0x2bf   :  { %v961_v0 = vpop.permute.xlu1 %960 }
 0x2c0   :  { %v976_v16 = vsel %vm765_vm3, %v945_v6, %v961_v0 }
 0x2c1   :  { %v1009_v63 = vmul.f32 %v994_v12, %v976_v16 }
 0x2c3   :  { %v1025_v24 = vadd.f32 %v1009_v63, %v913_v5  ;;  %v981_v5 = vsel %vm765_vm3, %v955_v60, %v971_v53 }
 0x2c5   :  { %1041 = vst [vmem:[%s2799_s4 + $0x8] sm:$0xff] %v1025_v24 }
 0x2c6   :  { %v1002_v49 = vpop.permute.xlu2 %1001 }
 0x2c7   :  { %v1012_v29 = vmul.f32 %v1002_v49, %v986_v45  ;;  %v1013_v59 = vmul.f32 %v1002_v49, %v978_v20  ;;  %v1020_v25 = vmul.f32 %v1002_v49, %v990_v57  ;;  %v967_v36 = vpop.permute.xlu1 %966 }
 0x2c9   :  { %v1028_v40 = vadd.f32 %v1012_v29, %v2615_v13  ;;  %v1029_v62 = vadd.f32 %v1013_v59, %v2613_v22  ;;  %v1036_v4 = vadd.f32 %v1020_v25, %v2658_v50  ;;  %v985_v50 = vsel %vm765_vm3, %v931_v21, %v2639_v19 }
 0x2cb   :  { %1044 = vst [vmem:[%s2799_s4 + $0x20] sm:$0xff] %v1028_v40 }
 0x2cc   :  { %1045 = vst [vmem:[%s2799_s4 + $0x28] sm:$0xff] %v1029_v62 }
 0x2cd   :  { %1052 = vst [vmem:[%s2799_s4 + $0x60] sm:$0xff] %v1036_v4 }
 0x2cf   :  { %v973_v26 = vpop.permute.xlu1 %972 }
 0x2d0   :  { %v982_v13 = vsel %vm765_vm3, %v957_v55, %v973_v26 }
 0x2d1   :  { %v1021_v27 = vmul.f32 %v1002_v49, %v982_v13 }
 0x2d3   :  { %v1037_v22 = vadd.f32 %v1021_v27, %v2661_v9 }
 0x2d5   :  { %1053 = vst [vmem:[%s2799_s4 + $0x68] sm:$0xff] %v1037_v22 }
 0x2d7   :  { %v998_v9 = vpop.permute.xlu1 %997 }
 0x2d8   :  { %v1010_v35 = vmul.f32 %v998_v9, %v985_v50  ;;  %v1011_v42 = vmul.f32 %v998_v9, %v977_v23  ;;  %v1018_v3 = vmul.f32 %v998_v9, %v989_v58  ;;  %v1019_v37 = vmul.f32 %v998_v9, %v981_v5 }
 0x2da   :  { %v1026_v18 = vadd.f32 %v1010_v35, %v2645_v1  ;;  %v1027_v6 = vadd.f32 %v1011_v42, %v2647_v7  ;;  %v1034_v21 = vadd.f32 %v1018_v3, %v2649_v15  ;;  %v1035_v19 = vadd.f32 %v1019_v37, %v2651_v33 }
 0x2db   :  { %v991_v1 = vsel %vm765_vm3, %v943_v28, %v2663_v2  ;;  %v983_v7 = vsel %vm765_vm3, %v2663_v2, %v975_v44  ;;  %v979_v15 = vsel %vm765_vm3, %v2691_v17, %v967_v36 }
 0x2dc   :  { %1042 = vst [vmem:[%s2799_s4 + $0x10] sm:$0xff] %v1026_v18 }
 0x2dd   :  { %1043 = vst [vmem:[%s2799_s4 + $0x18] sm:$0xff] %v1027_v6 }
 0x2de   :  { %1050 = vst [vmem:[%s2799_s4 + $0x50] sm:$0xff] %v1034_v21 }
 0x2df   :  { %1051 = vst [vmem:[%s2799_s4 + $0x58] sm:$0xff] %v1035_v19  ;;  %v1006_v33 = vpop.permute.xlu1 %1005 }
 0x2e0   :  { %v1014_v47 = vmul.f32 %v1006_v33, %v2697_v39  ;;  %v1015_v53 = vmul.f32 %v1006_v33, %v979_v15  ;;  %v1022_v10 = vmul.f32 %v1006_v33, %v991_v1  ;;  %v1023_v12 = vmul.f32 %v1006_v33, %v983_v7 }
 0x2e2   :  { %v1030_v34 = vadd.f32 %v1014_v47, %v2678_v30  ;;  %v1031_v38 = vadd.f32 %v1015_v53, %v2681_v8  ;;  %v1038_v2 = vadd.f32 %v1022_v10, %v2684_v11  ;;  %v1039_v48 = vadd.f32 %v1023_v12, %v2687_v56 }
 0x2e4   :  { %1046 = vst [vmem:[%s2799_s4 + $0x30] sm:$0xff] %v1030_v34 }
 0x2e5   :  { %1047 = vst [vmem:[%s2799_s4 + $0x38] sm:$0xff] %v1031_v38 }
 0x2e6   :  { %1054 = vst [vmem:[%s2799_s4 + $0x70] sm:$0xff] %v1038_v2 }
 0x2e7   :  { %1055 = vst [vmem:[%s2799_s4 + $0x78] sm:$0xff] %v1039_v48 }

</bundles_post_ra>
